<compile_context>
chip_gen: v7x
topology: tpu7x:2x2x1
jax: 0.10.0
libtpu: 0.0.40
codegen_flags: <defaults>
</compile_context>

<pallas_src>
import math
import functools

import jax
import jax.numpy as jnp
from jax import lax
from jax.experimental import pallas as pl
from jax.experimental.pallas import tpu as pltpu


def _layer_norm(x, g, b, eps=1e-5):
    # x: (M, D), g/b: (1, D) -- float32 throughout (PyTorch eps=1e-5, biased var).
    mu = jnp.mean(x, axis=-1, keepdims=True)
    var = jnp.mean((x - mu) ** 2, axis=-1, keepdims=True)
    return (x - mu) * lax.rsqrt(var + eps) * g + b


def _encoder_kernel(spec_ref, pe_ref, wemb_ref, bemb_ref,
                    wqkv_ref, bqkv_ref, wo_ref, bo_ref,
                    ln1g_ref, ln1b_ref, w1_ref, b1_ref,
                    w2_ref, b2_ref, ln2g_ref, ln2b_ref,
                    wdec_ref, bdec_ref, out_ref, x_ref, *, nhead):
    f32, bf16 = jnp.float32, jnp.bfloat16
    bc, _, S = spec_ref.shape           # batches handled by this grid point
    D = wqkv_ref.shape[0]               # per-layer weight refs are squeezed
    Dh = D // nhead
    M = bc * S
    layer = pl.program_id(1)
    n_layers = pl.num_programs(1)

    # ---- layer-0 prologue: input embedding + positional encoding into the
    # persistent activation scratch.  PE add is folded into row construction.
    @pl.when(layer == 0)
    def _():
        wemb = wemb_ref[...]            # (1, D)
        bemb = bemb_ref[...]            # (1, D)
        pe = pe_ref[...]                # (S, D)
        sqrt_d = jnp.float32(math.sqrt(D))
        for b in range(bc):             # static, bc in {1, 2}
            col = spec_ref[b].T         # (1, S) -> (S, 1): one tiny transpose
            x_ref[b * S:(b + 1) * S, :] = (col * wemb + bemb) * sqrt_d + pe

    x = x_ref[...]                      # (M, D) float32

    # ---- fused Q|K|V projection: one MXU push with N = 3D.
    qkv = jnp.dot(x.astype(bf16), wqkv_ref[...],
                  preferred_element_type=f32) + bqkv_ref[...]        # (M, 3D)
    qkvb = qkv.astype(bf16)             # single cast site for q/k/v

    # ---- multi-head attention: batches and heads batched into ONE pair of
    # dot_generals over BH = bc * nhead (no per-head MXU pushes).
    def split_heads(base):
        parts = []
        for b in range(bc):
            for h in range(nhead):
                parts.append(qkvb[b * S:(b + 1) * S,
                                  base + h * Dh:base + (h + 1) * Dh])
        return jnp.stack(parts, axis=0)                              # (BH,S,Dh)

    qh = split_heads(0 * D)
    kh = split_heads(1 * D)
    vh = split_heads(2 * D)

    s = jnp.einsum("bqd,bkd->bqk", qh, kh,
                   preferred_element_type=f32)                       # (BH,S,S)
    s = s * jnp.float32(1.0 / math.sqrt(Dh))
    s = s - jnp.max(s, axis=-1, keepdims=True)
    p = jnp.exp(s)
    inv = pl.reciprocal(jnp.sum(p, axis=-1, keepdims=True),
                        approx=True)                                 # EUP slot
    pv = jnp.einsum("bqk,bkd->bqd", p.astype(bf16), vh,
                    preferred_element_type=f32) * inv                # (BH,S,Dh)

    # merge heads (cheap lane concat of Dh-wide slabs) -> ONE full-K W_o matmul
    rows = []
    for b in range(bc):
        rows.append(jnp.concatenate(
            [pv[b * nhead + h] for h in range(nhead)], axis=-1))     # (S, D)
    o = rows[0] if bc == 1 else jnp.concatenate(rows, axis=0)        # (M, D)
    attn = jnp.dot(o.astype(bf16), wo_ref[...],
                   preferred_element_type=f32) + bo_ref[...]

    x = _layer_norm(x + attn, ln1g_ref[...], ln1b_ref[...])

    # ---- feed-forward (relu): bf16 MXU operands, f32 accumulate / elementwise.
    h1 = jnp.dot(x.astype(bf16), w1_ref[...],
                 preferred_element_type=f32) + b1_ref[...]
    h1 = jnp.maximum(h1, 0.0)
    ff = jnp.dot(h1.astype(bf16), w2_ref[...],
                 preferred_element_type=f32) + b2_ref[...]
    x = _layer_norm(x + ff, ln2g_ref[...], ln2b_ref[...])
    x_ref[...] = x                      # carry activations to next layer

    # ---- last-layer epilogue: decoder Linear(D, 1) emitted as a lane-dense
    # (1, M) slab (no per-batch transposes, no lane-width-1 stores).
    @pl.when(layer == n_layers - 1)
    def _():
        dec = lax.dot_general(wdec_ref[...], x, (((1,), (1,)), ((), ())),
                              preferred_element_type=f32)            # (1, M)
        out_ref[0] = dec + bdec_ref[...]


def _default_batch_splits(B, S):
    # v7x has 2 TensorCores/chip, but splitting only pays when each core gets
    # enough rows to beat the duplicated per-core weight DMA.
    try:
        kind = jax.devices()[0].device_kind.lower()
    except Exception:
        return 1
    if ("v7" in kind or "7x" in kind) and B % 2 == 0 and (B * S) // 2 >= 256:
        return 2
    return 1


def transformer_predict(spec, params, *, nhead, batch_splits=None):
    B, S = spec.shape
    D = params["w_emb"].shape[1]
    L = params["wq"].shape[0]
    F = params["w1"].shape[2]

    if batch_splits is None:
        batch_splits = _default_batch_splits(B, S)
    GB = batch_splits
    assert B % GB == 0
    bc = B // GB
    M = bc * S

    bf16 = jnp.bfloat16
    # Pack Q|K|V into one matmul per layer; cast MXU weights to bf16.
    wqkv = jnp.concatenate([params["wq"], params["wk"], params["wv"]],
                           axis=2).astype(bf16)                      # (L, D, 3D)
    bqkv = jnp.concatenate([params["bq"], params["bk"], params["bv"]],
                           axis=2).astype(jnp.float32)               # (L, 1, 3D)
    wo = params["wo"].astype(bf16)
    w1 = params["w1"].astype(bf16)
    w2 = params["w2"].astype(bf16)
    # TODO(synk): pad D (and hence 3D, F) up to multiples of 128 here when the
    # model is scaled so q|k|v and head lane slices stay vreg-tile aligned.

    spec3 = spec.reshape(B, 1, S).astype(jnp.float32)  # lane-dense spec input

    def const(shape):
        n = len(shape)
        return pl.BlockSpec(shape, lambda g, l, n=n: (0,) * n)

    def per_layer(shape):
        # Streams one layer's block per "arbitrary" grid step; leading L dim is
        # squeezed so the kernel sees the plain (…) weight tile.
        n = len(shape)
        return pl.BlockSpec((None,) + shape, lambda g, l, n=n: (l,) + (0,) * n)

    in_specs = [
        pl.BlockSpec((bc, 1, S), lambda g, l: (g, 0, 0)),  # spec (lane-dense)
        const((S, D)),                                     # pe
        const((1, D)), const((1, D)),                      # input emb W, b
        per_layer((D, 3 * D)), per_layer((1, 3 * D)),      # fused Wqkv, bqkv
        per_layer((D, D)), per_layer((1, D)),              # Wo, bo
        per_layer((1, D)), per_layer((1, D)),              # ln1 gamma, beta
        per_layer((D, F)), per_layer((1, F)),              # W1, b1
        per_layer((F, D)), per_layer((1, D)),              # W2, b2
        per_layer((1, D)), per_layer((1, D)),              # ln2 gamma, beta
        const((1, D)), const((1, 1)),                      # decoder W, b
    ]

    kernel = functools.partial(_encoder_kernel, nhead=nhead)
    out3 = pl.pallas_call(
        kernel,
        out_shape=jax.ShapeDtypeStruct((GB, 1, M), jnp.float32),
        grid=(GB, L),
        in_specs=in_specs,
        out_specs=pl.BlockSpec((1, 1, M), lambda g, l: (g, 0, 0)),
        scratch_shapes=[pltpu.VMEM((M, D), jnp.float32)],  # persistent x
        compiler_params=pltpu.CompilerParams(
            dimension_semantics=("parallel", "arbitrary"),
            vmem_limit_bytes=48 * 1024 * 1024),  # explicit; v7x-safe headroom
    )(spec3, params["pe"], params["w_emb"], params["b_emb"],
      wqkv, bqkv, wo, params["bo"],
      params["ln1_g"], params["ln1_b"],
      w1, params["b1"], w2, params["b2"],
      params["ln2_g"], params["ln2_b"],
      params["w_dec"], params["b_dec"])
    return out3.reshape(GB, bc, S).reshape(B, S)


# --------------------------- pure-JAX reference ------------------------------
def reference(spec, p, *, nhead):
    B, S = spec.shape
    D = p["w_emb"].shape[1]
    L = p["wq"].shape[0]
    Dh = D // nhead
    x = spec[..., None] * p["w_emb"][None] + p["b_emb"][None]        # (B, S, D)
    x = x * math.sqrt(D) + p["pe"][None]

    def ln(y, g, b, eps=1e-5):
        mu = jnp.mean(y, axis=-1, keepdims=True)
        var = jnp.mean((y - mu) ** 2, axis=-1, keepdims=True)
        return (y - mu) / jnp.sqrt(var + eps) * g + b

    for l in range(L):
        q = x @ p["wq"][l] + p["bq"][l]
        k = x @ p["wk"][l] + p["bk"][l]
        v = x @ p["wv"][l] + p["bv"][l]
        qh = q.reshape(B, S, nhead, Dh).transpose(0, 2, 1, 3)
        kh = k.reshape(B, S, nhead, Dh).transpose(0, 2, 1, 3)
        vh = v.reshape(B, S, nhead, Dh).transpose(0, 2, 1, 3)
        s = jnp.einsum("bhqd,bhkd->bhqk", qh, kh) / math.sqrt(Dh)
        a = jax.nn.softmax(s, axis=-1)
        o = jnp.einsum("bhqk,bhkd->bhqd", a, vh).transpose(0, 2, 1, 3).reshape(B, S, D)
        attn = o @ p["wo"][l] + p["bo"][l]
        x = ln(x + attn, p["ln1_g"][l], p["ln1_b"][l])
        ff = jnp.maximum(x @ p["w1"][l] + p["b1"][l], 0.0) @ p["w2"][l] + p["b2"][l]
        x = ln(x + ff, p["ln2_g"][l], p["ln2_b"][l])
    return jnp.sum(x * p["w_dec"][None], axis=-1) + p["b_dec"][0, 0]


# --------------------------- parameter construction --------------------------
def make_params(key, *, n_grid, d_model, dim_feedforward, nlayers):
    S, D, F, L = n_grid, d_model, dim_feedforward, nlayers
    ks = jax.random.split(key, 16)

    # sinusoidal positional encoding (max_len = n_grid)
    pos = jnp.arange(S, dtype=jnp.float32)[:, None]
    div = jnp.exp(jnp.arange(0, D, 2, dtype=jnp.float32) * (-math.log(10000.0) / D))
    pe = jnp.zeros((S, D), jnp.float32)
    pe = pe.at[:, 0::2].set(jnp.sin(pos * div))
    pe = pe.at[:, 1::2].set(jnp.cos(pos * div))

    def w(k, shape, scale=0.05):
        return scale * jax.random.normal(k, shape, dtype=jnp.float32)

    return {
        "pe": pe,
        "w_emb": w(ks[0], (1, D)),        # Linear(1, D) weight (transposed)
        "b_emb": w(ks[1], (1, D)),
        "wq": w(ks[2], (L, D, D)), "bq": w(ks[3], (L, 1, D)),
        "wk": w(ks[4], (L, D, D)), "bk": w(ks[5], (L, 1, D)),
        "wv": w(ks[6], (L, D, D)), "bv": w(ks[7], (L, 1, D)),
        "wo": w(ks[8], (L, D, D)), "bo": w(ks[9], (L, 1, D)),
        "ln1_g": jnp.ones((L, 1, D), jnp.float32),
        "ln1_b": jnp.zeros((L, 1, D), jnp.float32),
        "w1": w(ks[10], (L, D, F)), "b1": w(ks[11], (L, 1, F)),
        "w2": w(ks[12], (L, F, D)), "b2": w(ks[13], (L, 1, D)),
        "ln2_g": jnp.ones((L, 1, D), jnp.float32),
        "ln2_b": jnp.zeros((L, 1, D), jnp.float32),
        "w_dec": w(ks[14], (1, D)),       # Linear(D, 1) weight (transposed)
        "b_dec": w(ks[15], (1, 1)),
    }


if __name__ == "__main__":
    B, n_grid, d_model, nhead, dim_ff, nlayers = 2, 16, 32, 4, 64, 2

    key = jax.random.PRNGKey(0)
    k_spec, k_params = jax.random.split(key)
    spec = jax.random.normal(k_spec, (B, n_grid), dtype=jnp.float32)
    params = make_params(k_params, n_grid=n_grid, d_model=d_model,
                         dim_feedforward=dim_ff, nlayers=nlayers)

    out = transformer_predict(spec, params, nhead=nhead)
    out = jax.block_until_ready(out)

    ref = reference(spec, params, nhead=nhead)
    assert out.shape == (B, n_grid)
    err = float(jnp.max(jnp.abs(out - ref)))
    # bf16 MXU operands + approx-reciprocal softmax => slightly looser tolerance
    # than the all-f32 reference.
    assert jnp.allclose(out, ref, rtol=2e-2, atol=2e-2), f"max abs err {err}"
    print("KERNEL_OK")
</pallas_src>

<mosaic_0001>
module attributes {stable_mosaic.version = 11 : i64} {
  func.func @_encoder_kernel(%arg0: i32, %arg1: i32, %arg2: memref<2x1x16xf32, #tpu.memory_space<vmem>>, %arg3: memref<16x32xf32, #tpu.memory_space<vmem>>, %arg4: memref<1x32xf32, #tpu.memory_space<vmem>>, %arg5: memref<1x32xf32, #tpu.memory_space<vmem>>, %arg6: memref<1x32x96xbf16, #tpu.memory_space<vmem>>, %arg7: memref<1x1x96xf32, #tpu.memory_space<vmem>>, %arg8: memref<1x32x32xbf16, #tpu.memory_space<vmem>>, %arg9: memref<1x1x32xf32, #tpu.memory_space<vmem>>, %arg10: memref<1x1x32xf32, #tpu.memory_space<vmem>>, %arg11: memref<1x1x32xf32, #tpu.memory_space<vmem>>, %arg12: memref<1x32x64xbf16, #tpu.memory_space<vmem>>, %arg13: memref<1x1x64xf32, #tpu.memory_space<vmem>>, %arg14: memref<1x64x32xbf16, #tpu.memory_space<vmem>>, %arg15: memref<1x1x32xf32, #tpu.memory_space<vmem>>, %arg16: memref<1x1x32xf32, #tpu.memory_space<vmem>>, %arg17: memref<1x1x32xf32, #tpu.memory_space<vmem>>, %arg18: memref<1x32xf32, #tpu.memory_space<vmem>>, %arg19: memref<1x1xf32, #tpu.memory_space<vmem>>, %arg20: memref<1x1x32xf32, #tpu.memory_space<vmem>>, %arg21: memref<32x32xf32, #tpu.memory_space<vmem>>) attributes {dimension_semantics = [#tpu.dimension_semantics<parallel>, #tpu.dimension_semantics<arbitrary>], iteration_bounds = array<i64: 1, 2>, scalar_prefetch = 0 : i64, scratch_operands = 1 : i64, tpu.core_type = #tpu.core_type<tc>, window_params = [{transform_indices = @transform_0, window_bounds = array<i64: 2, 1, 16>}, {pipeline_mode = #tpu.pipeline_mode<synchronous>, transform_indices = @transform_1, window_bounds = array<i64: 16, 32>}, {pipeline_mode = #tpu.pipeline_mode<synchronous>, transform_indices = @transform_2, window_bounds = array<i64: 1, 32>}, {pipeline_mode = #tpu.pipeline_mode<synchronous>, transform_indices = @transform_3, window_bounds = array<i64: 1, 32>}, {transform_indices = @transform_4, window_bounds = array<i64: 1, 32, 96>}, {transform_indices = @transform_5, window_bounds = array<i64: 1, 1, 96>}, {transform_indices = @transform_6, window_bounds = array<i64: 1, 32, 32>}, {transform_indices = @transform_7, window_bounds = array<i64: 1, 1, 32>}, {transform_indices = @transform_8, window_bounds = array<i64: 1, 1, 32>}, {transform_indices = @transform_9, window_bounds = array<i64: 1, 1, 32>}, {transform_indices = @transform_10, window_bounds = array<i64: 1, 32, 64>}, {transform_indices = @transform_11, window_bounds = array<i64: 1, 1, 64>}, {transform_indices = @transform_12, window_bounds = array<i64: 1, 64, 32>}, {transform_indices = @transform_13, window_bounds = array<i64: 1, 1, 32>}, {transform_indices = @transform_14, window_bounds = array<i64: 1, 1, 32>}, {transform_indices = @transform_15, window_bounds = array<i64: 1, 1, 32>}, {pipeline_mode = #tpu.pipeline_mode<synchronous>, transform_indices = @transform_16, window_bounds = array<i64: 1, 32>}, {pipeline_mode = #tpu.pipeline_mode<synchronous>, transform_indices = @transform_17, window_bounds = array<i64: 1, 1>}, {transform_indices = @transform_18, window_bounds = array<i64: 1, 1, 32>}]} {
    %c0_i32 = arith.constant 0 : i32
    %0 = arith.cmpi eq, %arg1, %c0_i32 : i32
    %1 = arith.extui %0 : i1 to i32
    %c0_i32_0 = arith.constant 0 : i32
    %2 = arith.cmpi ne, %1, %c0_i32_0 : i32
    scf.if %2 {
      %c0_60 = arith.constant 0 : index
      %c0_61 = arith.constant 0 : index
      %182 = vector.load %arg4[%c0_60, %c0_61] : memref<1x32xf32, #tpu.memory_space<vmem>>, vector<1x32xf32>
      %c0_62 = arith.constant 0 : index
      %c0_63 = arith.constant 0 : index
      %183 = vector.load %arg5[%c0_62, %c0_63] : memref<1x32xf32, #tpu.memory_space<vmem>>, vector<1x32xf32>
      %c0_64 = arith.constant 0 : index
      %c0_65 = arith.constant 0 : index
      %184 = vector.load %arg3[%c0_64, %c0_65] : memref<16x32xf32, #tpu.memory_space<vmem>>, vector<16x32xf32>
      %c0_66 = arith.constant 0 : index
      %c0_67 = arith.constant 0 : index
      %c0_68 = arith.constant 0 : index
      %185 = vector.load %arg2[%c0_66, %c0_67, %c0_68] : memref<2x1x16xf32, #tpu.memory_space<vmem>>, vector<1x1x16xf32>
      %186 = vector.shape_cast %185 : vector<1x1x16xf32> to vector<1x16xf32>
      %187 = tpu.transpose %186, [1, 0] : vector<1x16xf32> -> vector<16x1xf32>
      %188 = vector.broadcast %187 : vector<16x1xf32> to vector<16x32xf32>
      %189 = vector.broadcast %182 : vector<1x32xf32> to vector<16x32xf32>
      %190 = arith.mulf %188, %189 : vector<16x32xf32>
      %191 = vector.broadcast %183 : vector<1x32xf32> to vector<16x32xf32>
      %192 = arith.addf %190, %191 : vector<16x32xf32>
      %cst_69 = arith.constant 5.65685415 : f32
      %193 = vector.broadcast %cst_69 : f32 to vector<16x32xf32>
      %194 = arith.mulf %192, %193 : vector<16x32xf32>
      %195 = arith.addf %194, %184 : vector<16x32xf32>
      %c0_70 = arith.constant 0 : index
      %c0_71 = arith.constant 0 : index
      %196 = vector.load %arg21[%c0_70, %c0_71] : memref<32x32xf32, #tpu.memory_space<vmem>>, vector<16x32xf32>
      tpu.vector_store %arg21[%c0_70, %c0_71], %195 {strides = array<i32>} : memref<32x32xf32, #tpu.memory_space<vmem>>, vector<16x32xf32>,
      %c1 = arith.constant 1 : index
      %c0_72 = arith.constant 0 : index
      %c0_73 = arith.constant 0 : index
      %197 = vector.load %arg2[%c1, %c0_72, %c0_73] : memref<2x1x16xf32, #tpu.memory_space<vmem>>, vector<1x1x16xf32>
      %198 = vector.shape_cast %197 : vector<1x1x16xf32> to vector<1x16xf32>
      %199 = tpu.transpose %198, [1, 0] : vector<1x16xf32> -> vector<16x1xf32>
      %200 = vector.broadcast %199 : vector<16x1xf32> to vector<16x32xf32>
      %201 = vector.broadcast %182 : vector<1x32xf32> to vector<16x32xf32>
      %202 = arith.mulf %200, %201 : vector<16x32xf32>
      %203 = vector.broadcast %183 : vector<1x32xf32> to vector<16x32xf32>
      %204 = arith.addf %202, %203 : vector<16x32xf32>
      %cst_74 = arith.constant 5.65685415 : f32
      %205 = vector.broadcast %cst_74 : f32 to vector<16x32xf32>
      %206 = arith.mulf %204, %205 : vector<16x32xf32>
      %207 = arith.addf %206, %184 : vector<16x32xf32>
      %c16 = arith.constant 16 : index
      %c0_75 = arith.constant 0 : index
      %208 = vector.load %arg21[%c16, %c0_75] : memref<32x32xf32, #tpu.memory_space<vmem>>, vector<16x32xf32>
      tpu.vector_store %arg21[%c16, %c0_75], %207 {strides = array<i32>} : memref<32x32xf32, #tpu.memory_space<vmem>>, vector<16x32xf32>,
    } else {
    }
    %c0 = arith.constant 0 : index
    %c0_1 = arith.constant 0 : index
    %3 = vector.load %arg21[%c0, %c0_1] : memref<32x32xf32, #tpu.memory_space<vmem>>, vector<32x32xf32>
    %4 = arith.truncf %3 : vector<32x32xf32> to vector<32x32xbf16>
    %c0_2 = arith.constant 0 : index
    %c0_3 = arith.constant 0 : index
    %c0_4 = arith.constant 0 : index
    %5 = vector.load %arg6[%c0_2, %c0_3, %c0_4] : memref<1x32x96xbf16, #tpu.memory_space<vmem>>, vector<1x32x96xbf16>
    %6 = vector.shape_cast %5 : vector<1x32x96xbf16> to vector<32x96xbf16>
    %cst = arith.constant dense<0.000000e+00> : vector<32x96xf32>
    %7 = tpu.matmul %4, %6, %cst {dimension_numbers = #tpu.dot_dimension_numbers<[1], [0], [0], [1], [0, 0, 1, 1], [], []>} : vector<32x32xbf16>, vector<32x96xbf16>, vector<32x96xf32> -> vector<32x96xf32>
    %c0_5 = arith.constant 0 : index
    %c0_6 = arith.constant 0 : index
    %c0_7 = arith.constant 0 : index
    %8 = vector.load %arg7[%c0_5, %c0_6, %c0_7] : memref<1x1x96xf32, #tpu.memory_space<vmem>>, vector<1x1x96xf32>
    %9 = vector.shape_cast %8 : vector<1x1x96xf32> to vector<1x96xf32>
    %10 = vector.broadcast %9 : vector<1x96xf32> to vector<32x96xf32>
    %11 = arith.addf %7, %10 : vector<32x96xf32>
    %12 = arith.truncf %11 : vector<32x96xf32> to vector<32x96xbf16>
    %13 = vector.extract_strided_slice %12 {offsets = [0, 0], sizes = [16, 8], strides = [1, 1]} : vector<32x96xbf16> to vector<16x8xbf16>
    %14 = vector.extract_strided_slice %12 {offsets = [0, 8], sizes = [16, 8], strides = [1, 1]} : vector<32x96xbf16> to vector<16x8xbf16>
    %15 = vector.extract_strided_slice %12 {offsets = [0, 16], sizes = [16, 8], strides = [1, 1]} : vector<32x96xbf16> to vector<16x8xbf16>
    %16 = vector.extract_strided_slice %12 {offsets = [0, 24], sizes = [16, 8], strides = [1, 1]} : vector<32x96xbf16> to vector<16x8xbf16>
    %17 = vector.extract_strided_slice %12 {offsets = [16, 0], sizes = [16, 8], strides = [1, 1]} : vector<32x96xbf16> to vector<16x8xbf16>
    %18 = vector.extract_strided_slice %12 {offsets = [16, 8], sizes = [16, 8], strides = [1, 1]} : vector<32x96xbf16> to vector<16x8xbf16>
    %19 = vector.extract_strided_slice %12 {offsets = [16, 16], sizes = [16, 8], strides = [1, 1]} : vector<32x96xbf16> to vector<16x8xbf16>
    %20 = vector.extract_strided_slice %12 {offsets = [16, 24], sizes = [16, 8], strides = [1, 1]} : vector<32x96xbf16> to vector<16x8xbf16>
    %21 = vector.shape_cast %13 : vector<16x8xbf16> to vector<1x16x8xbf16>
    %22 = vector.shape_cast %14 : vector<16x8xbf16> to vector<1x16x8xbf16>
    %23 = vector.shape_cast %15 : vector<16x8xbf16> to vector<1x16x8xbf16>
    %24 = vector.shape_cast %16 : vector<16x8xbf16> to vector<1x16x8xbf16>
    %25 = vector.shape_cast %17 : vector<16x8xbf16> to vector<1x16x8xbf16>
    %26 = vector.shape_cast %18 : vector<16x8xbf16> to vector<1x16x8xbf16>
    %27 = vector.shape_cast %19 : vector<16x8xbf16> to vector<1x16x8xbf16>
    %28 = vector.shape_cast %20 : vector<16x8xbf16> to vector<1x16x8xbf16>
    %29 = tpu.concatenate %21, %22, %23, %24, %25, %26, %27, %28 in 0 : vector<1x16x8xbf16>, vector<1x16x8xbf16>, vector<1x16x8xbf16>, vector<1x16x8xbf16>, vector<1x16x8xbf16>, vector<1x16x8xbf16>, vector<1x16x8xbf16>, vector<1x16x8xbf16> -> vector<8x16x8xbf16>
    %30 = vector.extract_strided_slice %12 {offsets = [0, 32], sizes = [16, 8], strides = [1, 1]} : vector<32x96xbf16> to vector<16x8xbf16>
    %31 = vector.extract_strided_slice %12 {offsets = [0, 40], sizes = [16, 8], strides = [1, 1]} : vector<32x96xbf16> to vector<16x8xbf16>
    %32 = vector.extract_strided_slice %12 {offsets = [0, 48], sizes = [16, 8], strides = [1, 1]} : vector<32x96xbf16> to vector<16x8xbf16>
    %33 = vector.extract_strided_slice %12 {offsets = [0, 56], sizes = [16, 8], strides = [1, 1]} : vector<32x96xbf16> to vector<16x8xbf16>
    %34 = vector.extract_strided_slice %12 {offsets = [16, 32], sizes = [16, 8], strides = [1, 1]} : vector<32x96xbf16> to vector<16x8xbf16>
    %35 = vector.extract_strided_slice %12 {offsets = [16, 40], sizes = [16, 8], strides = [1, 1]} : vector<32x96xbf16> to vector<16x8xbf16>
    %36 = vector.extract_strided_slice %12 {offsets = [16, 48], sizes = [16, 8], strides = [1, 1]} : vector<32x96xbf16> to vector<16x8xbf16>
    %37 = vector.extract_strided_slice %12 {offsets = [16, 56], sizes = [16, 8], strides = [1, 1]} : vector<32x96xbf16> to vector<16x8xbf16>
    %38 = vector.shape_cast %30 : vector<16x8xbf16> to vector<1x16x8xbf16>
    %39 = vector.shape_cast %31 : vector<16x8xbf16> to vector<1x16x8xbf16>
    %40 = vector.shape_cast %32 : vector<16x8xbf16> to vector<1x16x8xbf16>
    %41 = vector.shape_cast %33 : vector<16x8xbf16> to vector<1x16x8xbf16>
    %42 = vector.shape_cast %34 : vector<16x8xbf16> to vector<1x16x8xbf16>
    %43 = vector.shape_cast %35 : vector<16x8xbf16> to vector<1x16x8xbf16>
    %44 = vector.shape_cast %36 : vector<16x8xbf16> to vector<1x16x8xbf16>
    %45 = vector.shape_cast %37 : vector<16x8xbf16> to vector<1x16x8xbf16>
    %46 = tpu.concatenate %38, %39, %40, %41, %42, %43, %44, %45 in 0 : vector<1x16x8xbf16>, vector<1x16x8xbf16>, vector<1x16x8xbf16>, vector<1x16x8xbf16>, vector<1x16x8xbf16>, vector<1x16x8xbf16>, vector<1x16x8xbf16>, vector<1x16x8xbf16> -> vector<8x16x8xbf16>
    %47 = vector.extract_strided_slice %12 {offsets = [0, 64], sizes = [16, 8], strides = [1, 1]} : vector<32x96xbf16> to vector<16x8xbf16>
    %48 = vector.extract_strided_slice %12 {offsets = [0, 72], sizes = [16, 8], strides = [1, 1]} : vector<32x96xbf16> to vector<16x8xbf16>
    %49 = vector.extract_strided_slice %12 {offsets = [0, 80], sizes = [16, 8], strides = [1, 1]} : vector<32x96xbf16> to vector<16x8xbf16>
    %50 = vector.extract_strided_slice %12 {offsets = [0, 88], sizes = [16, 8], strides = [1, 1]} : vector<32x96xbf16> to vector<16x8xbf16>
    %51 = vector.extract_strided_slice %12 {offsets = [16, 64], sizes = [16, 8], strides = [1, 1]} : vector<32x96xbf16> to vector<16x8xbf16>
    %52 = vector.extract_strided_slice %12 {offsets = [16, 72], sizes = [16, 8], strides = [1, 1]} : vector<32x96xbf16> to vector<16x8xbf16>
    %53 = vector.extract_strided_slice %12 {offsets = [16, 80], sizes = [16, 8], strides = [1, 1]} : vector<32x96xbf16> to vector<16x8xbf16>
    %54 = vector.extract_strided_slice %12 {offsets = [16, 88], sizes = [16, 8], strides = [1, 1]} : vector<32x96xbf16> to vector<16x8xbf16>
    %55 = vector.shape_cast %47 : vector<16x8xbf16> to vector<1x16x8xbf16>
    %56 = vector.shape_cast %48 : vector<16x8xbf16> to vector<1x16x8xbf16>
    %57 = vector.shape_cast %49 : vector<16x8xbf16> to vector<1x16x8xbf16>
    %58 = vector.shape_cast %50 : vector<16x8xbf16> to vector<1x16x8xbf16>
    %59 = vector.shape_cast %51 : vector<16x8xbf16> to vector<1x16x8xbf16>
    %60 = vector.shape_cast %52 : vector<16x8xbf16> to vector<1x16x8xbf16>
    %61 = vector.shape_cast %53 : vector<16x8xbf16> to vector<1x16x8xbf16>
    %62 = vector.shape_cast %54 : vector<16x8xbf16> to vector<1x16x8xbf16>
    %63 = tpu.concatenate %55, %56, %57, %58, %59, %60, %61, %62 in 0 : vector<1x16x8xbf16>, vector<1x16x8xbf16>, vector<1x16x8xbf16>, vector<1x16x8xbf16>, vector<1x16x8xbf16>, vector<1x16x8xbf16>, vector<1x16x8xbf16>, vector<1x16x8xbf16> -> vector<8x16x8xbf16>
    "tpu.trace_start"() <{level = 10 : i32, message = "bqd,bkd->bqk"}> : () -> ()
    %cst_8 = arith.constant dense<0.000000e+00> : vector<8x16x16xf32>
    %64 = tpu.matmul %29, %46, %cst_8 {dimension_numbers = #tpu.dot_dimension_numbers<[2], [2], [1], [1], [0, 0, 0, 1, 1, 1], [0], [0]>} : vector<8x16x8xbf16>, vector<8x16x8xbf16>, vector<8x16x16xf32> -> vector<8x16x16xf32>
    "tpu.trace_stop"() : () -> ()
    %cst_9 = arith.constant 0.353553385 : f32
    %65 = vector.broadcast %cst_9 : f32 to vector<8x16x16xf32>
    %66 = arith.mulf %64, %65 : vector<8x16x16xf32>
    %cst_10 = arith.constant dense<0xFF800000> : vector<8x16xf32>
    %67 = vector.multi_reduction <maximumf>, %66, %cst_10 [2] : vector<8x16x16xf32> to vector<8x16xf32>
    %68 = vector.shape_cast %67 : vector<8x16xf32> to vector<8x16x1xf32>
    %69 = vector.broadcast %68 : vector<8x16x1xf32> to vector<8x16x16xf32>
    %70 = arith.subf %66, %69 : vector<8x16x16xf32>
    %71 = math.exp %70 : vector<8x16x16xf32>
    %cst_11 = arith.constant dense<0.000000e+00> : vector<8x16xf32>
    %72 = vector.multi_reduction <add>, %71, %cst_11 [2] : vector<8x16x16xf32> to vector<8x16xf32>
    %73 = vector.shape_cast %72 : vector<8x16xf32> to vector<8x16x1xf32>
    %74 = tpu.reciprocal %73 {approx = true} : vector<8x16x1xf32> -> vector<8x16x1xf32>
    %75 = arith.truncf %71 : vector<8x16x16xf32> to vector<8x16x16xbf16>
    "tpu.trace_start"() <{level = 10 : i32, message = "bqk,bkd->bqd"}> : () -> ()
    %cst_12 = arith.constant dense<0.000000e+00> : vector<8x16x8xf32>
    %76 = tpu.matmul %75, %63, %cst_12 {dimension_numbers = #tpu.dot_dimension_numbers<[2], [1], [1], [2], [0, 0, 0, 1, 1, 2], [0], [0]>} : vector<8x16x16xbf16>, vector<8x16x8xbf16>, vector<8x16x8xf32> -> vector<8x16x8xf32>
    "tpu.trace_stop"() : () -> ()
    %77 = vector.broadcast %74 : vector<8x16x1xf32> to vector<8x16x8xf32>
    %78 = arith.mulf %76, %77 : vector<8x16x8xf32>
    %79 = vector.extract_strided_slice %78 {offsets = [0, 0, 0], sizes = [1, 16, 8], strides = [1, 1, 1]} : vector<8x16x8xf32> to vector<1x16x8xf32>
    %80 = vector.shape_cast %79 : vector<1x16x8xf32> to vector<16x8xf32>
    %81 = vector.extract_strided_slice %78 {offsets = [1, 0, 0], sizes = [1, 16, 8], strides = [1, 1, 1]} : vector<8x16x8xf32> to vector<1x16x8xf32>
    %82 = vector.shape_cast %81 : vector<1x16x8xf32> to vector<16x8xf32>
    %83 = vector.extract_strided_slice %78 {offsets = [2, 0, 0], sizes = [1, 16, 8], strides = [1, 1, 1]} : vector<8x16x8xf32> to vector<1x16x8xf32>
    %84 = vector.shape_cast %83 : vector<1x16x8xf32> to vector<16x8xf32>
    %85 = vector.extract_strided_slice %78 {offsets = [3, 0, 0], sizes = [1, 16, 8], strides = [1, 1, 1]} : vector<8x16x8xf32> to vector<1x16x8xf32>
    %86 = vector.shape_cast %85 : vector<1x16x8xf32> to vector<16x8xf32>
    %87 = tpu.concatenate %80, %82, %84, %86 in 1 : vector<16x8xf32>, vector<16x8xf32>, vector<16x8xf32>, vector<16x8xf32> -> vector<16x32xf32>
    %88 = vector.extract_strided_slice %78 {offsets = [4, 0, 0], sizes = [1, 16, 8], strides = [1, 1, 1]} : vector<8x16x8xf32> to vector<1x16x8xf32>
    %89 = vector.shape_cast %88 : vector<1x16x8xf32> to vector<16x8xf32>
    %90 = vector.extract_strided_slice %78 {offsets = [5, 0, 0], sizes = [1, 16, 8], strides = [1, 1, 1]} : vector<8x16x8xf32> to vector<1x16x8xf32>
    %91 = vector.shape_cast %90 : vector<1x16x8xf32> to vector<16x8xf32>
    %92 = vector.extract_strided_slice %78 {offsets = [6, 0, 0], sizes = [1, 16, 8], strides = [1, 1, 1]} : vector<8x16x8xf32> to vector<1x16x8xf32>
    %93 = vector.shape_cast %92 : vector<1x16x8xf32> to vector<16x8xf32>
    %94 = vector.extract_strided_slice %78 {offsets = [7, 0, 0], sizes = [1, 16, 8], strides = [1, 1, 1]} : vector<8x16x8xf32> to vector<1x16x8xf32>
    %95 = vector.shape_cast %94 : vector<1x16x8xf32> to vector<16x8xf32>
    %96 = tpu.concatenate %89, %91, %93, %95 in 1 : vector<16x8xf32>, vector<16x8xf32>, vector<16x8xf32>, vector<16x8xf32> -> vector<16x32xf32>
    %97 = tpu.concatenate %87, %96 in 0 : vector<16x32xf32>, vector<16x32xf32> -> vector<32x32xf32>
    %98 = arith.truncf %97 : vector<32x32xf32> to vector<32x32xbf16>
    %c0_13 = arith.constant 0 : index
    %c0_14 = arith.constant 0 : index
    %c0_15 = arith.constant 0 : index
    %99 = vector.load %arg8[%c0_13, %c0_14, %c0_15] : memref<1x32x32xbf16, #tpu.memory_space<vmem>>, vector<1x32x32xbf16>
    %100 = vector.shape_cast %99 : vector<1x32x32xbf16> to vector<32x32xbf16>
    %cst_16 = arith.constant dense<0.000000e+00> : vector<32x32xf32>
    %101 = tpu.matmul %98, %100, %cst_16 {dimension_numbers = #tpu.dot_dimension_numbers<[1], [0], [0], [1], [0, 0, 1, 1], [], []>} : vector<32x32xbf16>, vector<32x32xbf16>, vector<32x32xf32> -> vector<32x32xf32>
    %c0_17 = arith.constant 0 : index
    %c0_18 = arith.constant 0 : index
    %c0_19 = arith.constant 0 : index
    %102 = vector.load %arg9[%c0_17, %c0_18, %c0_19] : memref<1x1x32xf32, #tpu.memory_space<vmem>>, vector<1x1x32xf32>
    %103 = vector.shape_cast %102 : vector<1x1x32xf32> to vector<1x32xf32>
    %104 = vector.broadcast %103 : vector<1x32xf32> to vector<32x32xf32>
    %105 = arith.addf %101, %104 : vector<32x32xf32>
    %106 = arith.addf %3, %105 : vector<32x32xf32>
    %c0_20 = arith.constant 0 : index
    %c0_21 = arith.constant 0 : index
    %c0_22 = arith.constant 0 : index
    %107 = vector.load %arg10[%c0_20, %c0_21, %c0_22] : memref<1x1x32xf32, #tpu.memory_space<vmem>>, vector<1x1x32xf32>
    %108 = vector.shape_cast %107 : vector<1x1x32xf32> to vector<1x32xf32>
    %c0_23 = arith.constant 0 : index
    %c0_24 = arith.constant 0 : index
    %c0_25 = arith.constant 0 : index
    %109 = vector.load %arg11[%c0_23, %c0_24, %c0_25] : memref<1x1x32xf32, #tpu.memory_space<vmem>>, vector<1x1x32xf32>
    %110 = vector.shape_cast %109 : vector<1x1x32xf32> to vector<1x32xf32>
    %cst_26 = arith.constant dense<0.000000e+00> : vector<32xf32>
    %111 = vector.multi_reduction <add>, %106, %cst_26 [1] : vector<32x32xf32> to vector<32xf32>
    %112 = vector.shape_cast %111 : vector<32xf32> to vector<32x1xf32>
    %cst_27 = arith.constant 3.200000e+01 : f32
    %113 = vector.broadcast %cst_27 : f32 to vector<32x1xf32>
    %114 = arith.divf %112, %113 : vector<32x1xf32>
    %115 = vector.broadcast %114 : vector<32x1xf32> to vector<32x32xf32>
    %116 = arith.subf %106, %115 : vector<32x32xf32>
    %117 = arith.mulf %116, %116 : vector<32x32xf32>
    %cst_28 = arith.constant dense<0.000000e+00> : vector<32xf32>
    %118 = vector.multi_reduction <add>, %117, %cst_28 [1] : vector<32x32xf32> to vector<32xf32>
    %119 = vector.shape_cast %118 : vector<32xf32> to vector<32x1xf32>
    %cst_29 = arith.constant 3.200000e+01 : f32
    %120 = vector.broadcast %cst_29 : f32 to vector<32x1xf32>
    %121 = arith.divf %119, %120 : vector<32x1xf32>
    %122 = vector.broadcast %114 : vector<32x1xf32> to vector<32x32xf32>
    %123 = arith.subf %106, %122 : vector<32x32xf32>
    %cst_30 = arith.constant 9.99999974E-6 : f32
    %124 = vector.broadcast %cst_30 : f32 to vector<32x1xf32>
    %125 = arith.addf %121, %124 : vector<32x1xf32>
    %126 = math.rsqrt %125 : vector<32x1xf32>
    %127 = vector.broadcast %126 : vector<32x1xf32> to vector<32x32xf32>
    %128 = arith.mulf %123, %127 : vector<32x32xf32>
    %129 = vector.broadcast %108 : vector<1x32xf32> to vector<32x32xf32>
    %130 = arith.mulf %128, %129 : vector<32x32xf32>
    %131 = vector.broadcast %110 : vector<1x32xf32> to vector<32x32xf32>
    %132 = arith.addf %130, %131 : vector<32x32xf32>
    %133 = arith.truncf %132 : vector<32x32xf32> to vector<32x32xbf16>
    %c0_31 = arith.constant 0 : index
    %c0_32 = arith.constant 0 : index
    %c0_33 = arith.constant 0 : index
    %134 = vector.load %arg12[%c0_31, %c0_32, %c0_33] : memref<1x32x64xbf16, #tpu.memory_space<vmem>>, vector<1x32x64xbf16>
    %135 = vector.shape_cast %134 : vector<1x32x64xbf16> to vector<32x64xbf16>
    %cst_34 = arith.constant dense<0.000000e+00> : vector<32x64xf32>
    %136 = tpu.matmul %133, %135, %cst_34 {dimension_numbers = #tpu.dot_dimension_numbers<[1], [0], [0], [1], [0, 0, 1, 1], [], []>} : vector<32x32xbf16>, vector<32x64xbf16>, vector<32x64xf32> -> vector<32x64xf32>
    %c0_35 = arith.constant 0 : index
    %c0_36 = arith.constant 0 : index
    %c0_37 = arith.constant 0 : index
    %137 = vector.load %arg13[%c0_35, %c0_36, %c0_37] : memref<1x1x64xf32, #tpu.memory_space<vmem>>, vector<1x1x64xf32>
    %138 = vector.shape_cast %137 : vector<1x1x64xf32> to vector<1x64xf32>
    %139 = vector.broadcast %138 : vector<1x64xf32> to vector<32x64xf32>
    %140 = arith.addf %136, %139 : vector<32x64xf32>
    %cst_38 = arith.constant 0.000000e+00 : f32
    %141 = vector.broadcast %cst_38 : f32 to vector<32x64xf32>
    %142 = arith.maximumf %140, %141 : vector<32x64xf32>
    %143 = arith.truncf %142 : vector<32x64xf32> to vector<32x64xbf16>
    %c0_39 = arith.constant 0 : index
    %c0_40 = arith.constant 0 : index
    %c0_41 = arith.constant 0 : index
    %144 = vector.load %arg14[%c0_39, %c0_40, %c0_41] : memref<1x64x32xbf16, #tpu.memory_space<vmem>>, vector<1x64x32xbf16>
    %145 = vector.shape_cast %144 : vector<1x64x32xbf16> to vector<64x32xbf16>
    %cst_42 = arith.constant dense<0.000000e+00> : vector<32x32xf32>
    %146 = tpu.matmul %143, %145, %cst_42 {dimension_numbers = #tpu.dot_dimension_numbers<[1], [0], [0], [1], [0, 0, 1, 1], [], []>} : vector<32x64xbf16>, vector<64x32xbf16>, vector<32x32xf32> -> vector<32x32xf32>
    %c0_43 = arith.constant 0 : index
    %c0_44 = arith.constant 0 : index
    %c0_45 = arith.constant 0 : index
    %147 = vector.load %arg15[%c0_43, %c0_44, %c0_45] : memref<1x1x32xf32, #tpu.memory_space<vmem>>, vector<1x1x32xf32>
    %148 = vector.shape_cast %147 : vector<1x1x32xf32> to vector<1x32xf32>
    %149 = vector.broadcast %148 : vector<1x32xf32> to vector<32x32xf32>
    %150 = arith.addf %146, %149 : vector<32x32xf32>
    %151 = arith.addf %132, %150 : vector<32x32xf32>
    %c0_46 = arith.constant 0 : index
    %c0_47 = arith.constant 0 : index
    %c0_48 = arith.constant 0 : index
    %152 = vector.load %arg16[%c0_46, %c0_47, %c0_48] : memref<1x1x32xf32, #tpu.memory_space<vmem>>, vector<1x1x32xf32>
    %153 = vector.shape_cast %152 : vector<1x1x32xf32> to vector<1x32xf32>
    %c0_49 = arith.constant 0 : index
    %c0_50 = arith.constant 0 : index
    %c0_51 = arith.constant 0 : index
    %154 = vector.load %arg17[%c0_49, %c0_50, %c0_51] : memref<1x1x32xf32, #tpu.memory_space<vmem>>, vector<1x1x32xf32>
    %155 = vector.shape_cast %154 : vector<1x1x32xf32> to vector<1x32xf32>
    %cst_52 = arith.constant dense<0.000000e+00> : vector<32xf32>
    %156 = vector.multi_reduction <add>, %151, %cst_52 [1] : vector<32x32xf32> to vector<32xf32>
    %157 = vector.shape_cast %156 : vector<32xf32> to vector<32x1xf32>
    %cst_53 = arith.constant 3.200000e+01 : f32
    %158 = vector.broadcast %cst_53 : f32 to vector<32x1xf32>
    %159 = arith.divf %157, %158 : vector<32x1xf32>
    %160 = vector.broadcast %159 : vector<32x1xf32> to vector<32x32xf32>
    %161 = arith.subf %151, %160 : vector<32x32xf32>
    %162 = arith.mulf %161, %161 : vector<32x32xf32>
    %cst_54 = arith.constant dense<0.000000e+00> : vector<32xf32>
    %163 = vector.multi_reduction <add>, %162, %cst_54 [1] : vector<32x32xf32> to vector<32xf32>
    %164 = vector.shape_cast %163 : vector<32xf32> to vector<32x1xf32>
    %cst_55 = arith.constant 3.200000e+01 : f32
    %165 = vector.broadcast %cst_55 : f32 to vector<32x1xf32>
    %166 = arith.divf %164, %165 : vector<32x1xf32>
    %167 = vector.broadcast %159 : vector<32x1xf32> to vector<32x32xf32>
    %168 = arith.subf %151, %167 : vector<32x32xf32>
    %cst_56 = arith.constant 9.99999974E-6 : f32
    %169 = vector.broadcast %cst_56 : f32 to vector<32x1xf32>
    %170 = arith.addf %166, %169 : vector<32x1xf32>
    %171 = math.rsqrt %170 : vector<32x1xf32>
    %172 = vector.broadcast %171 : vector<32x1xf32> to vector<32x32xf32>
    %173 = arith.mulf %168, %172 : vector<32x32xf32>
    %174 = vector.broadcast %153 : vector<1x32xf32> to vector<32x32xf32>
    %175 = arith.mulf %173, %174 : vector<32x32xf32>
    %176 = vector.broadcast %155 : vector<1x32xf32> to vector<32x32xf32>
    %177 = arith.addf %175, %176 : vector<32x32xf32>
    %c0_57 = arith.constant 0 : index
    %c0_58 = arith.constant 0 : index
    %178 = vector.load %arg21[%c0_57, %c0_58] : memref<32x32xf32, #tpu.memory_space<vmem>>, vector<32x32xf32>
    tpu.vector_store %arg21[%c0_57, %c0_58], %177 {strides = array<i32>} : memref<32x32xf32, #tpu.memory_space<vmem>>, vector<32x32xf32>,
    %c1_i32 = arith.constant 1 : i32
    %179 = arith.cmpi eq, %arg1, %c1_i32 : i32
    %180 = arith.extui %179 : i1 to i32
    %c0_i32_59 = arith.constant 0 : i32
    %181 = arith.cmpi ne, %180, %c0_i32_59 : i32
    scf.if %181 {
      %c0_60 = arith.constant 0 : index
      %c0_61 = arith.constant 0 : index
      %182 = vector.load %arg18[%c0_60, %c0_61] : memref<1x32xf32, #tpu.memory_space<vmem>>, vector<1x32xf32>
      %cst_62 = arith.constant dense<0.000000e+00> : vector<1x32xf32>
      %183 = tpu.matmul %182, %177, %cst_62 {dimension_numbers = #tpu.dot_dimension_numbers<[1], [1], [0], [0], [0, 0, 1, 0], [], []>} : vector<1x32xf32>, vector<32x32xf32>, vector<1x32xf32> -> vector<1x32xf32>
      %c0_63 = arith.constant 0 : index
      %c0_64 = arith.constant 0 : index
      %184 = vector.load %arg19[%c0_63, %c0_64] : memref<1x1xf32, #tpu.memory_space<vmem>>, vector<1x1xf32>
      %185 = vector.broadcast %184 : vector<1x1xf32> to vector<1x32xf32>
      %186 = arith.addf %183, %185 : vector<1x32xf32>
      %c0_65 = arith.constant 0 : index
      %c0_66 = arith.constant 0 : index
      %c0_67 = arith.constant 0 : index
      %187 = vector.load %arg20[%c0_65, %c0_66, %c0_67] : memref<1x1x32xf32, #tpu.memory_space<vmem>>, vector<1x1x32xf32>
      %188 = vector.shape_cast %187 : vector<1x1x32xf32> to vector<1x32xf32>
      %189 = vector.shape_cast %186 : vector<1x32xf32> to vector<1x1x32xf32>
      tpu.vector_store %arg20[%c0_65, %c0_66, %c0_67], %189 {strides = array<i32>} : memref<1x1x32xf32, #tpu.memory_space<vmem>>, vector<1x1x32xf32>,
    } else {
    }
    return
  }
  func.func @transform_0(%arg0: i32, %arg1: i32) -> (i32, i32, i32) {
    %c0_i32 = arith.constant 0 : i32
    %c0_i32_0 = arith.constant 0 : i32
    %c0_i32_1 = arith.constant 0 : i32
    return %arg0, %c0_i32, %c0_i32_0 : i32, i32, i32
  }
  func.func @transform_1(%arg0: i32, %arg1: i32) -> (i32, i32) {
    %c0_i32 = arith.constant 0 : i32
    %c0_i32_0 = arith.constant 0 : i32
    %c0_i32_1 = arith.constant 0 : i32
    return %c0_i32, %c0_i32_0 : i32, i32
  }
  func.func @transform_2(%arg0: i32, %arg1: i32) -> (i32, i32) {
    %c0_i32 = arith.constant 0 : i32
    %c0_i32_0 = arith.constant 0 : i32
    %c0_i32_1 = arith.constant 0 : i32
    return %c0_i32, %c0_i32_0 : i32, i32
  }
  func.func @transform_3(%arg0: i32, %arg1: i32) -> (i32, i32) {
    %c0_i32 = arith.constant 0 : i32
    %c0_i32_0 = arith.constant 0 : i32
    %c0_i32_1 = arith.constant 0 : i32
    return %c0_i32, %c0_i32_0 : i32, i32
  }
  func.func @transform_4(%arg0: i32, %arg1: i32) -> (i32, i32, i32) {
    %c0_i32 = arith.constant 0 : i32
    %c0_i32_0 = arith.constant 0 : i32
    %c0_i32_1 = arith.constant 0 : i32
    return %arg1, %c0_i32, %c0_i32_0 : i32, i32, i32
  }
  func.func @transform_5(%arg0: i32, %arg1: i32) -> (i32, i32, i32) {
    %c0_i32 = arith.constant 0 : i32
    %c0_i32_0 = arith.constant 0 : i32
    %c0_i32_1 = arith.constant 0 : i32
    return %arg1, %c0_i32, %c0_i32_0 : i32, i32, i32
  }
  func.func @transform_6(%arg0: i32, %arg1: i32) -> (i32, i32, i32) {
    %c0_i32 = arith.constant 0 : i32
    %c0_i32_0 = arith.constant 0 : i32
    %c0_i32_1 = arith.constant 0 : i32
    return %arg1, %c0_i32, %c0_i32_0 : i32, i32, i32
  }
  func.func @transform_7(%arg0: i32, %arg1: i32) -> (i32, i32, i32) {
    %c0_i32 = arith.constant 0 : i32
    %c0_i32_0 = arith.constant 0 : i32
    %c0_i32_1 = arith.constant 0 : i32
    return %arg1, %c0_i32, %c0_i32_0 : i32, i32, i32
  }
  func.func @transform_8(%arg0: i32, %arg1: i32) -> (i32, i32, i32) {
    %c0_i32 = arith.constant 0 : i32
    %c0_i32_0 = arith.constant 0 : i32
    %c0_i32_1 = arith.constant 0 : i32
    return %arg1, %c0_i32, %c0_i32_0 : i32, i32, i32
  }
  func.func @transform_9(%arg0: i32, %arg1: i32) -> (i32, i32, i32) {
    %c0_i32 = arith.constant 0 : i32
    %c0_i32_0 = arith.constant 0 : i32
    %c0_i32_1 = arith.constant 0 : i32
    return %arg1, %c0_i32, %c0_i32_0 : i32, i32, i32
  }
  func.func @transform_10(%arg0: i32, %arg1: i32) -> (i32, i32, i32) {
    %c0_i32 = arith.constant 0 : i32
    %c0_i32_0 = arith.constant 0 : i32
    %c0_i32_1 = arith.constant 0 : i32
    return %arg1, %c0_i32, %c0_i32_0 : i32, i32, i32
  }
  func.func @transform_11(%arg0: i32, %arg1: i32) -> (i32, i32, i32) {
    %c0_i32 = arith.constant 0 : i32
    %c0_i32_0 = arith.constant 0 : i32
    %c0_i32_1 = arith.constant 0 : i32
    return %arg1, %c0_i32, %c0_i32_0 : i32, i32, i32
  }
  func.func @transform_12(%arg0: i32, %arg1: i32) -> (i32, i32, i32) {
    %c0_i32 = arith.constant 0 : i32
    %c0_i32_0 = arith.constant 0 : i32
    %c0_i32_1 = arith.constant 0 : i32
    return %arg1, %c0_i32, %c0_i32_0 : i32, i32, i32
  }
  func.func @transform_13(%arg0: i32, %arg1: i32) -> (i32, i32, i32) {
    %c0_i32 = arith.constant 0 : i32
    %c0_i32_0 = arith.constant 0 : i32
    %c0_i32_1 = arith.constant 0 : i32
    return %arg1, %c0_i32, %c0_i32_0 : i32, i32, i32
  }
  func.func @transform_14(%arg0: i32, %arg1: i32) -> (i32, i32, i32) {
    %c0_i32 = arith.constant 0 : i32
    %c0_i32_0 = arith.constant 0 : i32
    %c0_i32_1 = arith.constant 0 : i32
    return %arg1, %c0_i32, %c0_i32_0 : i32, i32, i32
  }
  func.func @transform_15(%arg0: i32, %arg1: i32) -> (i32, i32, i32) {
    %c0_i32 = arith.constant 0 : i32
    %c0_i32_0 = arith.constant 0 : i32
    %c0_i32_1 = arith.constant 0 : i32
    return %arg1, %c0_i32, %c0_i32_0 : i32, i32, i32
  }
  func.func @transform_16(%arg0: i32, %arg1: i32) -> (i32, i32) {
    %c0_i32 = arith.constant 0 : i32
    %c0_i32_0 = arith.constant 0 : i32
    %c0_i32_1 = arith.constant 0 : i32
    return %c0_i32, %c0_i32_0 : i32, i32
  }
  func.func @transform_17(%arg0: i32, %arg1: i32) -> (i32, i32) {
    %c0_i32 = arith.constant 0 : i32
    %c0_i32_0 = arith.constant 0 : i32
    %c0_i32_1 = arith.constant 0 : i32
    return %c0_i32, %c0_i32_0 : i32, i32
  }
  func.func @transform_18(%arg0: i32, %arg1: i32) -> (i32, i32, i32) {
    %c0_i32 = arith.constant 0 : i32
    %c0_i32_0 = arith.constant 0 : i32
    %c0_i32_1 = arith.constant 0 : i32
    return %arg0, %c0_i32, %c0_i32_0 : i32, i32, i32
  }
}

</mosaic_0001>

<bundles_post_ra>
// kernel: tpu_custom_call.1
= control target key start
LH: loop header
LB: loop body
LE: loop exit
PB: predicated region body
PF: predicated region fallthrough
CT: control target
= control target key end

     0   :  { %s4034_s0 = inlined_call_operand.vmem [shape: f32[2,1,16], index: 0, kind: input, shape index: {}]   ;;  %s4035_s1 = inlined_call_operand.hbm [shape: f32[16,32], index: 1, kind: input, shape index: {}]   ;;  %s4036_s2 = inlined_call_operand.vmem [shape: f32[1,32], index: 2, kind: input, shape index: {}]   ;;  %s4037_s3 = inlined_call_operand.hbm [shape: f32[1,32], index: 3, kind: input, shape index: {}]   ;;  %s4038_s4 = inlined_call_operand.vmem [shape: bf16[2,32,96], index: 4, kind: input, shape index: {}]   ;;  %s4039_s5 = inlined_call_operand.vmem [shape: f32[2,1,96], index: 5, kind: input, shape index: {}]   ;;  %s4040_s6 = inlined_call_operand.vmem [shape: bf16[2,32,32], index: 6, kind: input, shape index: {}]   ;;  %s4041_s7 = inlined_call_operand.vmem [shape: f32[2,1,32], index: 7, kind: input, shape index: {}]   ;;  %s4042_s8 = inlined_call_operand.vmem [shape: f32[2,1,32], index: 8, kind: input, shape index: {}]   ;;  %s4043_s9 = inlined_call_operand.vmem [shape: f32[2,1,32], index: 9, kind: input, shape index: {}]   ;;  %s4044_s10 = inlined_call_operand.vmem [shape: bf16[2,32,64], index: 10, kind: input, shape index: {}]   ;;  %s4045_s11 = inlined_call_operand.vmem [shape: f32[2,1,64], index: 11, kind: input, shape index: {}]   ;;  %s4046_s12 = inlined_call_operand.vmem [shape: bf16[2,64,32], index: 12, kind: input, shape index: {}]   ;;  %s4047_s13 = inlined_call_operand.vmem [shape: f32[2,1,32], index: 13, kind: input, shape index: {}]   ;;  %s4048_s14 = inlined_call_operand.vmem [shape: f32[2,1,32], index: 14, kind: input, shape index: {}]   ;;  %s4049_s15 = inlined_call_operand.vmem [shape: f32[2,1,32], index: 15, kind: input, shape index: {}]   ;;  %s4050_s16 = inlined_call_operand.vmem [shape: f32[1,32], index: 16, kind: input, shape index: {}]   ;;  %s4051_s17 = inlined_call_operand.<no memory space> [shape: f32[1,1], index: 17, kind: input, shape index: {}]   ;;  %s4052_s18 = inlined_call_operand.hbm [shape: f32[1,1,32], index: 18, kind: output, shape index: {}]  }
   0x1   :  { %4063 = sst [smem:[#allocation16_spill]] %s4034_s0  ;;  %v23_v0 = vstv %s4051_s17 }
   0x2   :  { %4064 = sst [smem:[#allocation17_spill]] %s4035_s1  ;;  %24 = vst [vmem:[#allocation3] sm:$0x1] %v23_v0 }
   0x3   :  { %4065 = sst [smem:[#allocation18_spill]] %s4036_s2 }
   0x4   :  { %4066 = sst [smem:[#allocation19_spill]] %s4037_s3 }
   0x5   :  { %4067 = sst [smem:[#allocation20_spill]] %s4038_s4 }
   0x6   :  { %4068 = sst [smem:[#allocation21_spill]] %s4040_s6 }
   0x7   :  { %4069 = sst [smem:[#allocation22_spill]] %s4050_s16 }
   0x8   :  { %4070 = sst [smem:[#allocation23_spill]] %s4052_s18 }
   0x9   :  { %25 = vsyncpa [#allocation5], 0 }
   0xa   :  { %26 = vsyncpa [#allocation8], 0 }
   0xb   :  { %27 = vsyncpa [#allocation6], 0  ;;  %s3502_s29 = smov 0   ;;  %s3504_s30 = smov 0  }
   0xc   :  { %s3506_s0 = smov 0  }
   0xd LB: > { %4071 = sst [smem:[#allocation13_spill]] %s3378_s30  ;;  %s4055_s17 = sadd.s32 4294967295, %s3382_s0   ;;  %s3382_s0 = sphi %s3506_s0, %s33_s0   ;;  %s3378_s30 = sphi %s3504_s30, %s4096_s30   ;;  %s3374_s29 = sphi %s3502_s29, %s4095_s29  }
   0xe   : > { %4072 = sst [smem:[#allocation14_spill]] %s3382_s0  ;;  %s42_s19 = sadd.s32 1, %s3378_s30 }
   0xf   : > { %p43_p0 = scmp.ge.s32.totalorder %s42_s19, 2  ;;  %p2787_p1 = scmp.ge.s32.totalorder %s3382_s0, 1 }
  0x10   : > { %p519_p2 = scmp.lt.s32.totalorder %s3382_s0, 3  ;;  %p3529_p4 = scmp.eq.s32.totalorder %s4055_s17, 0 }
  0x11   : > { %s4098_s19 = smov (%p43_p0, %s42_s19), 0  ;;  %s3384_s21 = smov [#allocation4]  }
  0x12   : > { %4073 = sst [smem:[#allocation15_spill]] %s4098_s19  ;;  %p3523_p3 = pnand %p2787_p1, %p519_p2 }
  0x13   : > { %s4075_s20 = scalar_select %p3529_p4, 1, 0 }
  0x14   : > { %s4074_s1 = scalar_select %p3523_p3, 1, 0 }
  0x15   : > { %p3081_p5 = pneg %p3523_p3  ;;  %s539_s22 = sshll.u32 %s3384_s21, 4  ;;  %s540_s22 = int_to_ptr.vmem [resolvable:$true] %s539_s22 }
  0x16   : > { %s3385_s23 = smov [#allocation7]   ;;  %s4077_s27 = sld [smem:[#allocation17_spill]] }
  0x17   : > { %p3537_p6 = pnand %p3529_p4, %p3081_p5  ;;  %s556_s24 = sshll.u32 %s3385_s23, 4  ;;  %s3541_s24 = int_to_ptr.vmem [resolvable:$true] %s556_s24 }
  0x19   : > { %p3268_p8 = pneg %p3537_p6 }
  0x1c   : > { %s3266_s28 = scalar_lea.hbm %s4077_s27, 256 }
  0x1d   : > { %p3267_p7 = scmp.ne.s32.totalorder %s4077_s27, %s3266_s28  ;;  %p3273_p11 = scmp.lt.u32.totalorder %s3266_s28, %s4077_s27 }
  0x1f   : > { %p3269_p9 = pnand %p3268_p8, %p3267_p7 }
  0x21   : > { %p3270_p10 = pneg %p3269_p9 }
  0x23   : > { %p3275_p12 = pnand %p3273_p11, %p3270_p10 }
  0x25   : > { %3278 = shalt.err (!%p3275_p12)
}
  0x26   : > { %s3279_s23 = scalar_lea.vmem %s540_s22, 256  ;;  %p3287_p2 = scmp.lt.s32.totalorder %s540_s22, %s540_s22 }
  0x27   : > { %p3280_p13 = scmp.ne.s32.totalorder %s540_s22, %s3279_s23  ;;  %p3288_p5 = scmp.lt.s32.totalorder %s3279_s23, %s3279_s23 }
  0x29   : > { %p3282_p0 = pnand %p3280_p13, %p3268_p8  ;;  %p3289_p4 = por %p3288_p5, %p3287_p2 }
  0x2b   : > { %p3283_p1 = pneg %p3282_p0 }
  0x2d   : > { %p3290_p3 = pnand %p3289_p4, %p3283_p1 }
  0x2f   : > { %3293 = shalt.err (!%p3290_p3)
}
  0x30   : > { %s3386_s17 = smov 128   ;;  %s3387_s19 = smov 8  }
  0x31   : > { %3084 = dma.hbm_to_vmem [thread:$0]  (!%p3537_p6), %s4077_s27, 256, %s540_s22, [#allocation5], %s3386_s17, %s3386_s17, %s3387_s19  }
  0x32   : > { %s4078_s3 = sld [smem:[#allocation19_spill]] }
  0x38   : > { %s3294_s21 = scalar_lea.hbm %s4078_s3, 16 }
  0x39   : > { %p3295_p7 = scmp.ne.s32.totalorder %s4078_s3, %s3294_s21  ;;  %p3301_p9 = scmp.lt.u32.totalorder %s3294_s21, %s4078_s3 }
  0x3b   : > { %p3297_p3 = pnand %p3295_p7, %p3268_p8 }
  0x3d   : > { %p3298_p4 = pneg %p3297_p3 }
  0x3f   : > { %p3303_p10 = pnand %p3301_p9, %p3298_p4 }
  0x41   : > { %3306 = shalt.err (!%p3303_p10)
}
  0x42   : > { %s3307_s22 = scalar_lea.vmem %s3541_s24, 16  ;;  %s3314_s18 = scalar_lea.vmem %s3541_s24, 32 }
  0x43   : > { %p3308_p11 = scmp.ne.s32.totalorder %s3541_s24, %s3307_s22  ;;  %p3315_p0 = scmp.lt.s32.totalorder %s3541_s24, %s3541_s24 }
  0x44   : > { %p3316_p1 = scmp.lt.s32.totalorder %s3314_s18, %s3307_s22 }
  0x45   : > { %p3310_p12 = pnand %p3308_p11, %p3268_p8 }
  0x46   : > { %p3317_p2 = por %p3316_p1, %p3315_p0 }
  0x47   : > { %p3311_p13 = pneg %p3310_p12 }
  0x49   : > { %p3318_p5 = pnand %p3317_p2, %p3311_p13 }
  0x4b   : > { %3321 = shalt.err (!%p3318_p5)
}
  0x4c   : > { %3087 = dma.hbm_to_vmem [thread:$0]  (!%p3537_p6), %s4078_s3, 16, %s3541_s24, [#allocation8]  }
  0x4d   : > { %p4079_p7 = scmp.ne.s32.totalorder %s4074_s1, 0 }
  0x4e   : > { %p4080_p8 = scmp.ne.s32.totalorder (!%p4079_p7), %s4075_s20, 0 }
  0x4f   : > { %655 = sbr.rel (%p4079_p7) target bundleno = 3145 (0xc49), region = 92 }
  0x56   : > { %3361 = dma.done.wait (%p4080_p8), [#allocation5], 256  }
  0x57   : > { %3363 = vsyncadd (%p4080_p8), [#allocation5], 4294967040 }
  0x58   : > { %3365 = dma.done.wait (%p4080_p8), [#allocation8], 16  }
  0x59   : > { %3367 = vsyncadd (%p4080_p8), [#allocation8], 4294967280  ;;  %p756_p3 = scmp.lt.s32.totalorder %s3374_s29, 1  ;;  %s4081_s4 = sld [smem:[#allocation20_spill]] }
  0x5a   : > { %s4082_s6 = sld [smem:[#allocation21_spill]]  ;;  %p2803_p6 = scmp.ne.s32.totalorder %s3374_s29, 0 }
  0x5b   : > { %s3603_s2 = scalar_select %p756_p3, %s3374_s29, 1 }
  0x5c   : > { %804 = sbr.rel (%p2803_p6) target bundleno = 377 (0x179), region = 104  ;;  %s4083_s23 = sld [smem:[#allocation16_spill]] (!%p2803_p6)  ;;  %v3388_v2 = vmov (!%p2803_p6), 0   ;;  %v2805_v10 = vld [vmem:[#allocation7] ss:$0 sm:$0xff] (!%p2803_p6)  ;;  %v807_v13 = vld [vmem:[#allocation4] sm:$0xff] (!%p2803_p6) }
  0x5d   : > { %s2859_s1 = sshll.u32 %s3603_s2, 4  ;;  %s2862_s27 = sshll.u32 %s3603_s2, 5  ;;  %3139 = vset.pattern.permute.xlu1 (!%p2803_p6), %v3388_v2  ;;  %vm872_vm0 = vcmask (!%p2803_p6), 261120   ;;  %v808_v19 = vld [vmem:[#allocation4 + $0x8] sm:$0xff] (!%p2803_p6) }
  0x5e   : > { %s3645_s18 = scalar_lea.vmem %s4046_s12, %s2862_s27  ;;  %s793_s24 = scalar_lea.vmem %s4047_s13, %s3603_s2 }
  0x5f   : > { %s3613_s25 = scalar_lea.vmem %s4081_s4, %s2859_s1  ;;  %s3635_s4 = scalar_lea.vmem %s4044_s10, %s2859_s1 }
  0x60   : > { %s3618_s21 = scalar_lea.vmem %s4082_s6, %s2859_s1  ;;  %s785_s6 = scalar_lea.vmem %s4045_s11, %s3603_s2 }
  0x61   : > { %s796_s19 = scalar_lea.vmem %s4048_s14, %s3603_s2  ;;  %s799_s3 = scalar_lea.vmem %s4049_s15, %s3603_s2 }
  0x62   : > { %v809_v1 = vld [vmem:[%s4083_s23] sm:$0x1] (!%p2803_p6)  ;;  %v2806_v3 = vld [vmem:[%s4083_s23 + $0x1] sm:$0x1] (!%p2803_p6)  ;;  %s4084_s0 = sld [smem:[#allocation18_spill]] (!%p2803_p6) }
  0x63   : > { %810 = vxpose.xlu0.b32.start.end [1/1] (short) (narrow) %v809_v1, 16 }
  0x68   : > { %877 = vxpose.xlu0.b32.start.end [1/1] (short) (narrow) %v2806_v3, 16  ;;  %v2804_v8 = vld [vmem:[%s4084_s0] ss:$0 sm:$0xff] }
  0x91   : > { %3140 = vset.pattern.permute.xlu0 %v3388_v2 }
  0xe3   : > { %v826_v4 = vpop.trf.xlu0 }
  0xe4   : > { %844 = vperm.xlu1 %3139, %v826_v4  }
  0xe7   : > { %v827_v5 = vpop.trf.xlu0 }
  0xe8   : > { %849 = vperm.xlu1 %3139, %v827_v5  }
  0xeb   : > { %v893_v6 = vpop.trf.xlu0 }
  0xec   : > { %911 = vperm.xlu1 %3139, %v893_v6  }
  0xef   : > { %v894_v7 = vpop.trf.xlu0 }
  0xf0   : > { %916 = vperm.xlu0 %3140, %v894_v7  }
 0x163   : > { %v845_v9 = vpop.permute.xlu1 %844 }
 0x164   : > { %v858_v11 = vmul.f32 %v2804_v8, %v845_v9 }
 0x166   : > { %v866_v12 = vadd.f32 %v2805_v10, %v858_v11 }
 0x167   : > { %v850_v14 = vpop.permute.xlu1 %849 }
 0x168   : > { %v868_v15 = vmul.f32 5.656854, %v866_v12  ;;  %v859_v16 = vmul.f32 %v2804_v8, %v850_v14 }
 0x16a   : > { %v870_v17 = vadd.f32 %v868_v15, %v807_v13  ;;  %v867_v18 = vadd.f32 %v2805_v10, %v859_v16 }
 0x16b   : > { %v912_v20 = vpop.permute.xlu1 %911 }
 0x16c   : > { %873 = vst.msk [vmem:[#allocation2] sm:$0xff] %vm872_vm0, %v870_v17  ;;  %v869_v21 = vmul.f32 5.656854, %v867_v18  ;;  %v919_v22 = vmul.f32 %v2804_v8, %v912_v20 }
 0x16e   : > { %v871_v23 = vadd.f32 %v869_v21, %v808_v19  ;;  %v921_v24 = vadd.f32 %v2805_v10, %v919_v22 }
 0x16f   : > { %v917_v25 = vpop.permute.xlu0 %916 }
 0x170   : > { %874 = vst.msk [vmem:[#allocation2 + $0x8] sm:$0xff] %vm872_vm0, %v871_v23  ;;  %v923_v26 = vmul.f32 5.656854, %v921_v24  ;;  %v920_v27 = vmul.f32 %v2804_v8, %v917_v25 }
 0x172   : > { %v925_v28 = vadd.f32 %v923_v26, %v807_v13  ;;  %v922_v29 = vadd.f32 %v2805_v10, %v920_v27 }
 0x174   : > { %927 = vst.msk [vmem:[#allocation2 + $0x10] sm:$0xff] %vm872_vm0, %v925_v28  ;;  %v924_v30 = vmul.f32 5.656854, %v922_v29 }
 0x176   : > { %v926_v31 = vadd.f32 %v924_v30, %v808_v19 }
 0x178   : > { %928 = vst.msk [vmem:[#allocation2 + $0x18] sm:$0xff] %vm872_vm0, %v926_v31 }
 0x179 PF: > { %v3171_v32 = vld [vmem:[%s3613_s25] sm:$0xff]   ;;  %v3172_v33 = vld [vmem:[%s3613_s25 + $0x8] sm:$0xff]   ;;  %vm958_vm1 = vcmask 261120   ;;  %s4085_s25 = scalar_lea.vmem %s4039_s5, %s3603_s2  ;;  %v3389_v51 = vmov 0.0   ;;  %s3390_s30 = smov 104   ;;  %vm3393_vm2 = vmmov 0  }
 0x17a   : > { %2918 = vmatprep.subr.bf16.mxu0 %v3171_v32  ;;  %v929_v34 = vld [vmem:[#allocation2] sm:$0xff]  ;;  %v930_v35 = vld [vmem:[#allocation2 + $0x8] sm:$0xff]  ;;  %2926 = vmatprep.subr.bf16.mxu1 %v3389_v51  ;;  %s3391_s26 = smov 120   ;;  %s3392_s28 = smov 112   ;;  %vm1032_vm3 = vcmask 64512   ;;  %vm1439_vm4 = vcmask 130048  }
 0x17b   : > { %v931_v36 = vld [vmem:[#allocation2 + $0x10] sm:$0xff]  ;;  %2919 = vmatpush3.bf16.msra.mxu0 %v3171_v32  ;;  %v933_v37 = vpack.c.bf16 %v930_v35, %v929_v34  ;;  %v2807_v41 = vld [vmem:[%s4085_s25] ss:$0 sm:$0xff]  ;;  %2928 = vmatprep.mubr.msk.bf16.mxu1 %vm3393_vm2, %v3389_v51  ;;  %s3394_s27 = smov 96   ;;  %s3395_s22 = smov 64   ;;  %vm2028_vm5 = vcmask 195584  }
 0x17c   : > { %2920 = vmatprep.subr.bf16.mxu0 %v3172_v33  ;;  %s3396_s20 = smov 8   ;;  %s3397_s16 = smov 16   ;;  %vm2345_vm6 = vcmask 523264  }
 0x17d   : > { %2922 = vmatprep.mubr.msk.bf16.mxu0 %vm958_vm1, %v933_v37  ;;  %s3398_s0 = smov 24   ;;  %s4086_s1 = scalar_lea.vmem %s4041_s7, %s3603_s2 }
 0x17e   : > { %p2849_p4 = scmp.ne.s32.totalorder %s3374_s29, 1 }
 0x17f   : > { %v932_v38 = vld [vmem:[#allocation2 + $0x18] sm:$0xff]  ;;  %2921 = vmatpush3.bf16.msra.mxu0 %v3172_v33  ;;  %vm3063_vm7 = vmpackc.low (!%p2849_p4), %vm958_vm1, %vm958_vm1  ;;  %vm3400_vm8 = vmmov (!%p2849_p4), 0   ;;  %vm2583_vm9 = vcmask (!%p2849_p4), 253952  }
 0x180   : > { %v934_v39 = vpack.c.bf16 %v932_v38, %v931_v36  ;;  %2932 = vmatprep.subr.bf16.mxu0 %v3389_v51 }
 0x182   : > { %2923 = vmatmul.mubr.msk.bf16.vlgmr.msra.gmra.mrb[0].mxu0 %vm958_vm1, %v934_v39 }
 0x183   : > { %2934 = vmatprep.mubr.msk.bf16.mxu0 %vm3393_vm2, %v3389_v51 }
 0x255   : > { %v2924_v40 = vpop.f32.mrb[0].mxu0 }
 0x256   : > { %v999_v42 = vpop.f32.mrb[1].mxu0  ;;  %v1008_v44 = vadd.f32 %v2924_v40, %v2807_v41 }
 0x257   : > { %v2925_v43 = vpop.f32.mrb[2].mxu0  ;;  %v1000_v47 = vadd.f32 %v2807_v41, %v999_v42 }
 0x258   : > { %v1011_v45 = vadd.f32 %v2925_v43, %v2807_v41  ;;  %v1002_v46 = vpop.f32.mrb[3].mxu0 }
 0x259   : > { %v1003_v48 = vadd.f32 %v2807_v41, %v1002_v46 }
 0x25a   : > { %v3682_v49 = vpack.c.bf16 %v1011_v45, %v1008_v44 }
 0x25b   : > { %v1014_v50 = vpack.c.bf16 %v1003_v48, %v1000_v47 }
 0x25d   : > { %1021 = vrot.lane.b32.xlu1 %v1014_v50, %s3390_s30  ;;  %1017 = vrot.lane.b32.xlu0 %v1014_v50, %s3391_s26 }
 0x261   : > { %1024 = vrot.lane.b32.xlu1 %v3682_v49, %s3391_s26  ;;  %1019 = vrot.lane.b32.xlu0 %v1014_v50, %s3392_s28 }
 0x265   : > { %1028 = vrot.lane.b32.xlu1 %v3682_v49, %s3390_s30  ;;  %1026 = vrot.lane.b32.xlu0 %v3682_v49, %s3392_s28  ;;  %s4087_s30 = scalar_lea.vmem %s4042_s8, %s3603_s2 }
 0x269   : > { %1030 = vrot.lane.b32.xlu0 %v1014_v50, %s3394_s27 }
 0x2cf   : > { %v1022_v52 = vpop.permute.xlu1 %1021  ;;  %v1018_v53 = vpop.permute.xlu0 %1017 }
 0x2d0   : > { %1080 = vrot.lane.b32.xlu1 %v1018_v53, %s3394_s27 }
 0x2d3   : > { %v1020_v54 = vpop.permute.xlu0 %1019  ;;  %v1025_v55 = vpop.permute.xlu1 %1024 }
 0x2d4   : > { %1178 = vrot.lane.b32.xlu1 %v1022_v52, %s3394_s27  ;;  %1129 = vrot.lane.b32.xlu0 %v1020_v54, %s3394_s27 }
 0x2d7   : > { %v3693_v56 = vpop.permute.xlu0 %1026  ;;  %v3696_v57 = vpop.permute.xlu1 %1028 }
 0x2d8   : > { %1276 = vrot.lane.b32.xlu1 %v1025_v55, %s3394_s27  ;;  %1227 = vrot.lane.b32.xlu0 %v3682_v49, %s3394_s27 }
 0x2db   : > { %v1031_v58 = vpop.permute.xlu0 %1030 }
 0x2dc   : > { %1374 = vrot.lane.b32.xlu1 %v3696_v57, %s3394_s27  ;;  %1325 = vrot.lane.b32.xlu0 %v3693_v56, %s3394_s27  ;;  %v1037_v59 = vsel %vm1032_vm3, %v1031_v58, 0  ;;  %s4088_s27 = scalar_lea.vmem %s4043_s9, %s3603_s2  ;;  %s4089_s2 = sld [smem:[#allocation22_spill]] (!%p2849_p4) }
 0x2dd   : > { %2927 = vmatpush3.bf16.xpose.msra.mxu1 %v1037_v59 }
 0x2de   : > { %2938 = vmatprep.subr.bf16.mxu1 %v3389_v51 }
 0x2e0   : > { %1608 = vrot.lane.b32.xlu1 %v1014_v50, %s3395_s22  ;;  %1796 = vrot.lane.b32.xlu0 %v3682_v49, %s3395_s22 }
 0x2e4   : > { %1843 = vrot.lane.b32.xlu1 %v1025_v55, %s3395_s22  ;;  %1655 = vrot.lane.b32.xlu0 %v1018_v53, %s3395_s22 }
 0x2e5   : > { %2929 = vmatmul.mubr.msk.bf16.vlgmr.msra.gmra.mrb[0].mxu1 %vm1032_vm3, %v1014_v50 }
 0x2e6   : > { %2940 = vmatprep.mubr.msk.bf16.mxu1 %vm3393_vm2, %v3389_v51 }
 0x2e8   : > { %1702 = vrot.lane.b32.xlu1 %v1020_v54, %s3395_s22 }
 0x2ec   : > { %1749 = vrot.lane.b32.xlu1 %v1022_v52, %s3395_s22 }
 0x342   : > { %v1081_v60 = vpop.permute.xlu1 %1080 }
 0x343   : > { %v1086_v61 = vsel %vm1032_vm3, %v1081_v60, 0 }
 0x344   : > { %2933 = vmatpush3.bf16.xpose.msra.mxu0 %v1086_v61 }
 0x345   : > { %2944 = vmatprep.subr.bf16.mxu0 %v3389_v51 }
 0x346   : > { %v1130_v62 = vpop.permute.xlu0 %1129  ;;  %v1179_v0 = vpop.permute.xlu1 %1178 }
 0x347   : > { %v1135_v63 = vsel %vm1032_vm3, %v1130_v62, 0  ;;  %v1184_v1 = vsel %vm1032_vm3, %v1179_v0, 0 }
 0x348   : > { %2939 = vmatpush3.bf16.xpose.msra.mxu1 %v1135_v63 }
 0x349   : > { %2950 = vmatprep.subr.bf16.mxu1 %v3389_v51 }
 0x34a   : > { %v1228_v2 = vpop.permute.xlu0 %1227  ;;  %v1277_v4 = vpop.permute.xlu1 %1276 }
 0x34b   : > { %2935 = vmatmul.mubr.msk.bf16.vlgmr.msra.gmra.mrb[4].mxu0 %vm1032_vm3, %v1018_v53  ;;  %v1233_v3 = vsel %vm1032_vm3, %v1228_v2, 0  ;;  %v1282_v5 = vsel %vm1032_vm3, %v1277_v4, 0 }
 0x34c   : > { %2945 = vmatpush3.bf16.xpose.msra.mxu0 %v1184_v1  ;;  %2946 = vmatprep.mubr.msk.bf16.mxu0 %vm3393_vm2, %v3389_v51 }
 0x34d   : > { %2956 = vmatprep.subr.bf16.mxu0 %v3389_v51 }
 0x34e   : > { %v1326_v6 = vpop.permute.xlu0 %1325  ;;  %v1375_v8 = vpop.permute.xlu1 %1374 }
 0x34f   : > { %2941 = vmatmul.mubr.msk.bf16.vlgmr.msra.gmra.mrb[4].mxu1 %vm1032_vm3, %v1020_v54  ;;  %v1331_v7 = vsel %vm1032_vm3, %v1326_v6, 0  ;;  %v1380_v9 = vsel %vm1032_vm3, %v1375_v8, 0 }
 0x350   : > { %2951 = vmatpush3.bf16.xpose.msra.mxu1 %v1233_v3  ;;  %2952 = vmatprep.mubr.msk.bf16.mxu1 %vm3393_vm2, %v3389_v51 }
 0x351   : > { %2962 = vmatprep.subr.bf16.mxu1 %v3389_v51 }
 0x352   : > { %v3741_v10 = vpop.permute.xlu0 %1796  ;;  %v1609_v11 = vpop.permute.xlu1 %1608 }
 0x353   : > { %2947 = vmatmul.mubr.msk.bf16.vlgmr.msra.gmra.mrb[8].mxu0 %vm1032_vm3, %v1022_v52 }
 0x354   : > { %2957 = vmatpush3.bf16.xpose.msra.mxu0 %v1282_v5  ;;  %2958 = vmatprep.mubr.msk.bf16.mxu0 %vm3393_vm2, %v3389_v51 }
 0x355   : > { %2968 = vmatprep.subr.bf16.mxu0 %v3389_v51 }
 0x356   : > { %v1656_v12 = vpop.permute.xlu0 %1655 }
 0x357   : > { %2953 = vmatmul.mubr.msk.bf16.vlgmr.msra.gmra.mrb[8].mxu1 %vm1032_vm3, %v3682_v49 }
 0x358   : > { %2963 = vmatpush3.bf16.xpose.msra.mxu1 %v1331_v7  ;;  %2964 = vmatprep.mubr.msk.bf16.mxu1 %vm3393_vm2, %v3389_v51 }
 0x359   : > { %2974 = vmatprep.subr.bf16.mxu1 %v3389_v51 }
 0x35b   : > { %2959 = vmatmul.mubr.msk.bf16.vlgmr.msra.gmra.mrb[12].mxu0 %vm1032_vm3, %v1025_v55 }
 0x35c   : > { %2969 = vmatpush3.bf16.xpose.msra.mxu0 %v1380_v9  ;;  %2970 = vmatprep.mubr.msk.bf16.mxu0 %vm3393_vm2, %v3389_v51 }
 0x35d   : > { %2980 = vmatprep.subr.bf16.mxu0 %v3389_v51 }
 0x35f   : > { %2965 = vmatmul.mubr.msk.bf16.vlgmr.msra.gmra.mrb[12].mxu1 %vm1032_vm3, %v3693_v56 }
 0x360   : > { %2975 = vmatpush3.bf16.msra.mxu1 %v1609_v11  ;;  %2976 = vmatprep.mubr.msk.bf16.mxu1 %vm3393_vm2, %v3389_v51 }
 0x361   : > { %2986 = vmatprep.subr.bf16.mxu1 %v3389_v51 }
 0x363   : > { %2971 = vmatmul.mubr.msk.bf16.vlgmr.msra.gmra.mrb[16].mxu0 %vm1032_vm3, %v3696_v57 }
 0x364   : > { %2981 = vmatpush3.bf16.msra.mxu0 %v1656_v12  ;;  %2982 = vmatprep.mubr.msk.bf16.mxu0 %vm3393_vm2, %v3389_v51 }
 0x365   : > { %2992 = vmatprep.subr.bf16.mxu0 %v3389_v51 }
 0x3b8   : > { %v1073_v13 = vpop.f32.mrb[0].mxu1 }
 0x3b9   : > { %v3754_v14 = vmul.f32 0.35355338, %v1073_v13  ;;  %v2930_v15 = vpop.f32.mrb[1].mxu1 }
 0x3ba   : > { %v1076_v16 = vpop.f32.mrb[2].mxu1 }
 0x3bb   : > { %v3756_v17 = vmul.f32 0.35355338, %v1076_v16  ;;  %v2931_v18 = vpop.f32.mrb[3].mxu1  ;;  %v1440_v19 = vsel %vm1439_vm4, %v3754_v14, -inf }
 0x3bc   : > { %1441 = vmax.xlane.f32.xlu0 %v1440_v19  ;;  %v3816_v18 = vpop.permute.xlu1 %1843 }
 0x3bd   : > { %v1443_v20 = vsel %vm1439_vm4, %v3756_v17, -inf }
 0x3be   : > { %1444 = vmax.xlane.f32.xlu1 %v1443_v20 }
 0x3c0   : > { %v1703_v20 = vpop.permute.xlu1 %1702 }
 0x41e   : > { %v1122_v21 = vpop.f32.mrb[4].mxu0 }
 0x41f   : > { %v3762_v22 = vmul.f32 0.35355338, %v1122_v21  ;;  %v2936_v23 = vpop.f32.mrb[5].mxu0  ;;  %v3820_v21 = vpop.permute.xlu1 %1749 }
 0x420   : > { %v1125_v24 = vpop.f32.mrb[6].mxu0 }
 0x421   : > { %v3764_v25 = vmul.f32 0.35355338, %v1125_v24  ;;  %v2937_v26 = vpop.f32.mrb[7].mxu0  ;;  %v1446_v27 = vsel %vm1439_vm4, %v3762_v22, -inf }
 0x422   : > { %1447 = vmax.xlane.f32.xlu0 %v1446_v27  ;;  %v1171_v28 = vpop.f32.mrb[4].mxu1 }
 0x423   : > { %v3768_v29 = vmul.f32 0.35355338, %v1171_v28  ;;  %v2942_v30 = vpop.f32.mrb[5].mxu1  ;;  %v1449_v34 = vsel %vm1439_vm4, %v3764_v25, -inf }
 0x424   : > { %v1174_v31 = vpop.f32.mrb[6].mxu1 }
 0x425   : > { %v3770_v32 = vmul.f32 0.35355338, %v1174_v31  ;;  %v2943_v33 = vpop.f32.mrb[7].mxu1  ;;  %v1452_v35 = vsel %vm1439_vm4, %v3768_v29, -inf }
 0x426   : > { %v1220_v36 = vpop.f32.mrb[8].mxu0  ;;  %1450 = vmax.xlane.f32.xlu0 %v1449_v34  ;;  %1453 = vmax.xlane.f32.xlu1 %v1452_v35 }
 0x427   : > { %v3776_v37 = vmul.f32 0.35355338, %v1220_v36  ;;  %v2948_v38 = vpop.f32.mrb[9].mxu0  ;;  %v1455_v43 = vsel %vm1439_vm4, %v3770_v32, -inf }
 0x428   : > { %v1223_v39 = vpop.f32.mrb[10].mxu0 }
 0x429   : > { %v3778_v40 = vmul.f32 0.35355338, %v1223_v39  ;;  %v2949_v41 = vpop.f32.mrb[11].mxu0  ;;  %v1458_v42 = vsel %vm1439_vm4, %v3776_v37, -inf }
 0x42a   : > { %1459 = vmax.xlane.f32.xlu1 %v1458_v42  ;;  %1456 = vmax.xlane.f32.xlu0 %v1455_v43  ;;  %v1269_v44 = vpop.f32.mrb[8].mxu1 }
 0x42b   : > { %v3784_v45 = vmul.f32 0.35355338, %v1269_v44  ;;  %v2954_v46 = vpop.f32.mrb[9].mxu1  ;;  %v1461_v50 = vsel %vm1439_vm4, %v3778_v40, -inf }
 0x42c   : > { %v1272_v47 = vpop.f32.mrb[10].mxu1 }
 0x42d   : > { %v3786_v48 = vmul.f32 0.35355338, %v1272_v47  ;;  %v2955_v49 = vpop.f32.mrb[11].mxu1  ;;  %v1464_v52 = vsel %vm1439_vm4, %v3784_v45, -inf }
 0x42e   : > { %v1318_v53 = vpop.f32.mrb[12].mxu0  ;;  %1462 = vmax.xlane.f32.xlu0 %v1461_v50  ;;  %1465 = vmax.xlane.f32.xlu1 %v1464_v52 }
 0x42f   : > { %v3792_v54 = vmul.f32 0.35355338, %v1318_v53  ;;  %v2960_v55 = vpop.f32.mrb[13].mxu0  ;;  %v1467_v62 = vsel %vm1439_vm4, %v3786_v48, -inf }
 0x430   : > { %v1321_v58 = vpop.f32.mrb[14].mxu0 }
 0x431   : > { %v3794_v59 = vmul.f32 0.35355338, %v1321_v58  ;;  %v2961_v60 = vpop.f32.mrb[15].mxu0  ;;  %v1470_v61 = vsel %vm1439_vm4, %v3792_v54, -inf }
 0x432   : > { %1471 = vmax.xlane.f32.xlu1 %v1470_v61  ;;  %1468 = vmax.xlane.f32.xlu0 %v1467_v62  ;;  %v1367_v63 = vpop.f32.mrb[12].mxu1 }
 0x433   : > { %v3800_v0 = vmul.f32 0.35355338, %v1367_v63  ;;  %v2966_v1 = vpop.f32.mrb[13].mxu1  ;;  %v1473_v5 = vsel %vm1439_vm4, %v3794_v59, -inf }
 0x434   : > { %v1370_v2 = vpop.f32.mrb[14].mxu1 }
 0x435   : > { %v3802_v3 = vmul.f32 0.35355338, %v1370_v2  ;;  %v2967_v4 = vpop.f32.mrb[15].mxu1  ;;  %v1476_v6 = vsel %vm1439_vm4, %v3800_v0, -inf }
 0x436   : > { %v1416_v7 = vpop.f32.mrb[16].mxu0  ;;  %1474 = vmax.xlane.f32.xlu0 %v1473_v5  ;;  %1477 = vmax.xlane.f32.xlu1 %v1476_v6 }
 0x437   : > { %v3808_v8 = vmul.f32 0.35355338, %v1416_v7  ;;  %v2972_v9 = vpop.f32.mrb[17].mxu0  ;;  %v1479_v16 = vsel %vm1439_vm4, %v3802_v3, -inf }
 0x438   : > { %v1419_v11 = vpop.f32.mrb[18].mxu0 }
 0x439   : > { %v3810_v12 = vmul.f32 0.35355338, %v1419_v11  ;;  %v2973_v13 = vpop.f32.mrb[19].mxu0  ;;  %v1482_v15 = vsel %vm1439_vm4, %v3808_v8, -inf }
 0x43a   : > { %1483 = vmax.xlane.f32.xlu1 %v1482_v15  ;;  %1480 = vmax.xlane.f32.xlu0 %v1479_v16 }
 0x43b   : > { %v1485_v19 = vsel %vm1439_vm4, %v3810_v12, -inf }
 0x43e   : > { %1486 = vmax.xlane.f32.xlu0 %v1485_v19 }
 0x449   : > { %v1442_v23 = vpop.xlane.xlu0 %1441 }
 0x44a   : > { %v1488_v24 = vsub.f32 %v3754_v14, %v1442_v23 }
 0x44b   : > { %v1445_v26 = vpop.xlane.xlu1 %1444  ;;  %1937 = vrot.lane.b32.xlu1 %v3696_v57, %s3395_s22 }
 0x44c   : > { %v1504_v27 = vmul.f32 1.442695, %v1488_v24  ;;  %v1489_v28 = vsub.f32 %v3756_v17, %v1445_v26 }
 0x44e   : > { %v1506_v30 = vmul.f32 1.442695, %v1489_v28  ;;  %3181 = vpow2.f32 %v1504_v27 }
 0x450   : > { %3183 = vpow2.f32 %v1506_v30 }
 0x454   : > { %1890 = vrot.lane.b32.xlu0 %v3693_v56, %s3395_s22 }
 0x458   : > { %v3828_v31 = vpop.eup %3181 }
 0x45a   : > { %v3830_v33 = vpop.eup %3183 }
 0x45b   : > { %v1600_v14 = vpack.c.bf16 %v3830_v33, %v3828_v31 }
 0x45d   : > { %2977 = vmatmul.mubr.msk.bf16.vlgmr.msra.gmra.mrb[16].mxu1 %vm1439_vm4, %v1600_v14 }
 0x45e   : > { %2987 = vmatpush3.bf16.msra.mxu1 %v1703_v20  ;;  %2988 = vmatprep.mubr.msk.bf16.mxu1 %vm3393_vm2, %v3389_v51 }
 0x45f   : > { %2998 = vmatprep.subr.bf16.mxu1 %v3389_v51 }
 0x4af   : > { %v1448_v57 = vpop.xlane.xlu0 %1447 }
 0x4b0   : > { %v1490_v17 = vsub.f32 %v3762_v22, %v1448_v57 }
 0x4b2   : > { %v1508_v34 = vmul.f32 1.442695, %v1490_v17 }
 0x4b3   : > { %v1454_v56 = vpop.xlane.xlu1 %1453  ;;  %v1451_v35 = vpop.xlane.xlu0 %1450 }
 0x4b4   : > { %3185 = vpow2.f32 %v1508_v34  ;;  %v1492_v36 = vsub.f32 %v3768_v29, %v1454_v56  ;;  %v1491_v38 = vsub.f32 %v3764_v25, %v1451_v35 }
 0x4b6   : > { %v1512_v39 = vmul.f32 1.442695, %v1492_v36  ;;  %v1510_v41 = vmul.f32 1.442695, %v1491_v38 }
 0x4b7   : > { %v1460_v42 = vpop.xlane.xlu1 %1459  ;;  %v1457_v43 = vpop.xlane.xlu0 %1456 }
 0x4b8   : > { %3187 = vpow2.f32 %v1512_v39  ;;  %v1494_v44 = vsub.f32 %v3776_v37, %v1460_v42  ;;  %v1493_v46 = vsub.f32 %v3770_v32, %v1457_v43 }
 0x4b9   : > { %3189 = vpow2.f32 %v1510_v41 }
 0x4ba   : > { %v1516_v47 = vmul.f32 1.442695, %v1494_v44  ;;  %v1514_v22 = vmul.f32 1.442695, %v1493_v46 }
 0x4bb   : > { %v1466_v49 = vpop.xlane.xlu1 %1465  ;;  %v1463_v50 = vpop.xlane.xlu0 %1462 }
 0x4bc   : > { %3191 = vpow2.f32 %v1516_v47  ;;  %v1496_v52 = vsub.f32 %v3784_v45, %v1466_v49  ;;  %v1495_v29 = vsub.f32 %v3778_v40, %v1463_v50 }
 0x4bd   : > { %3193 = vpow2.f32 %v1514_v22  ;;  %v1536_v22 = vsel %vm1439_vm4, %v3828_v31, 0.0 }
 0x4be   : > { %v3186_v25 = vpop.eup %3185  ;;  %v1518_v53 = vmul.f32 1.442695, %v1495_v29  ;;  %v1520_v55 = vmul.f32 1.442695, %v1496_v52  ;;  %v1539_v29 = vsel %vm1439_vm4, %v3830_v33, 0.0 }
 0x4bf   : > { %v1472_v58 = vpop.xlane.xlu1 %1471  ;;  %v1469_v60 = vpop.xlane.xlu0 %1468  ;;  %v1542_v37 = vsel %vm1439_vm4, %v3186_v25, 0.0 }
 0x4c0   : > { %v1498_v32 = vsub.f32 %v3792_v54, %v1472_v58  ;;  %v1497_v61 = vsub.f32 %v3786_v48, %v1469_v60  ;;  %1543 = vadd.xlane.f32.xlu0 %v1542_v37  ;;  %3195 = vpow2.f32 %v1518_v53 }
 0x4c1   : > { %3197 = vpow2.f32 %v1520_v55 }
 0x4c2   : > { %v3188_v62 = vpop.eup %3187  ;;  %v1524_v63 = vmul.f32 1.442695, %v1498_v32  ;;  %v1522_v1 = vmul.f32 1.442695, %v1497_v61 }
 0x4c3   : > { %v3190_v45 = vpop.eup %3189  ;;  %v1478_v40 = vpop.xlane.xlu1 %1477  ;;  %v1548_v4 = vsel %vm1439_vm4, %v3188_v62, 0.0 }
 0x4c4   : > { %v1475_v2 = vpop.xlane.xlu0 %1474  ;;  %3199 = vpow2.f32 %v1524_v63  ;;  %v1500_v5 = vsub.f32 %v3800_v0, %v1478_v40  ;;  %1549 = vadd.xlane.f32.xlu0 %v1548_v4  ;;  %v1545_v54 = vsel %vm1439_vm4, %v3190_v45, 0.0  ;;  %v1601_v48 = vpack.c.bf16 %v3190_v45, %v3186_v25 }
 0x4c5   : > { %v1499_v6 = vsub.f32 %v3794_v59, %v1475_v2  ;;  %3201 = vpow2.f32 %v1522_v1  ;;  %1546 = vadd.xlane.f32.xlu1 %v1545_v54 }
 0x4c6   : > { %v3192_v7 = vpop.eup %3191  ;;  %v1528_v9 = vmul.f32 1.442695, %v1500_v5  ;;  %2983 = vmatmul.mubr.msk.bf16.vlgmr.msra.gmra.mrb[20].mxu0 %vm1439_vm4, %v1601_v48 }
 0x4c7   : > { %v1526_v11 = vmul.f32 1.442695, %v1499_v6  ;;  %v3194_v13 = vpop.eup %3193  ;;  %v1484_v15 = vpop.xlane.xlu1 %1483  ;;  %v1554_v19 = vsel %vm1439_vm4, %v3192_v7, 0.0  ;;  %2993 = vmatpush3.bf16.msra.mxu0 %v3820_v21  ;;  %2994 = vmatprep.mubr.msk.bf16.mxu0 %vm3393_vm2, %v3389_v51 }
 0x4c8   : > { %v1481_v16 = vpop.xlane.xlu0 %1480  ;;  %3203 = vpow2.f32 %v1528_v9  ;;  %v1502_v59 = vsub.f32 %v3808_v8, %v1484_v15  ;;  %v1551_v20 = vsel %vm1439_vm4, %v3194_v13, 0.0  ;;  %v1602_v23 = vpack.c.bf16 %v3194_v13, %v3188_v62  ;;  %3004 = vmatprep.subr.bf16.mxu0 %v3389_v51 }
 0x4c9   : > { %v1501_v0 = vsub.f32 %v3802_v3, %v1481_v16  ;;  %3205 = vpow2.f32 %v1526_v11  ;;  %1555 = vadd.xlane.f32.xlu1 %v1554_v19  ;;  %1552 = vadd.xlane.f32.xlu0 %v1551_v20 }
 0x4ca   : > { %v1532_v24 = vmul.f32 1.442695, %v1502_v59  ;;  %v3196_v27 = vpop.eup %3195  ;;  %2989 = vmatmul.mubr.msk.bf16.vlgmr.msra.gmra.mrb[20].mxu1 %vm1439_vm4, %v1602_v23 }
 0x4cb   : > { %v1530_v26 = vmul.f32 1.442695, %v1501_v0  ;;  %2999 = vmatpush3.bf16.msra.mxu1 %v3741_v10  ;;  %v1557_v8 = vsel %vm1439_vm4, %v3196_v27, 0.0  ;;  %v1603_v28 = vpack.c.bf16 %v3196_v27, %v3192_v7  ;;  %3000 = vmatprep.mubr.msk.bf16.mxu1 %vm3393_vm2, %v3389_v51  ;;  %v3198_v30 = vpop.eup %3197  ;;  %v1938_v42 = vpop.permute.xlu1 %1937 }
 0x4cc   : > { %v1487_v21 = vpop.xlane.xlu0 %1486  ;;  %3207 = vpow2.f32 %v1532_v24  ;;  %3010 = vmatprep.subr.bf16.mxu1 %v3389_v51  ;;  %v1560_v52 = vsel %vm1439_vm4, %v3198_v30, 0.0 }
 0x4cd   : > { %v1503_v3 = vsub.f32 %v3810_v12, %v1487_v21  ;;  %3209 = vpow2.f32 %v1530_v26  ;;  %1558 = vadd.xlane.f32.xlu0 %v1557_v8 }
 0x4ce   : > { %v3200_v14 = vpop.eup %3199  ;;  %2995 = vmatmul.mubr.msk.bf16.vlgmr.msra.gmra.mrb[24].mxu0 %vm1439_vm4, %v1603_v28 }
 0x4cf   : > { %v1534_v57 = vmul.f32 1.442695, %v1503_v3  ;;  %v3202_v17 = vpop.eup %3201  ;;  %v1566_v10 = vsel %vm1439_vm4, %v3200_v14, 0.0  ;;  %3005 = vmatpush3.bf16.msra.mxu0 %v3816_v18  ;;  %3006 = vmatprep.mubr.msk.bf16.mxu0 %vm3393_vm2, %v3389_v51 }
 0x4d0   : > { %1567 = vadd.xlane.f32.xlu1 %v1566_v10  ;;  %v1604_v12 = vpack.c.bf16 %v3202_v17, %v3198_v30  ;;  %v1891_v34 = vpop.permute.xlu0 %1890  ;;  %3016 = vmatprep.subr.bf16.mxu0 %v3389_v51 }
 0x4d1   : > { %3211 = vpow2.f32 %v1534_v57 }
 0x4d2   : > { %v3204_v56 = vpop.eup %3203  ;;  %3001 = vmatmul.mubr.msk.bf16.vlgmr.msra.gmra.mrb[24].mxu1 %vm1439_vm4, %v1604_v12 }
 0x4d3   : > { %v3206_v35 = vpop.eup %3205  ;;  %v1572_v36 = vsel %vm1439_vm4, %v3204_v56, 0.0  ;;  %3011 = vmatpush3.bf16.msra.mxu1 %v1891_v34  ;;  %3012 = vmatprep.mubr.msk.bf16.mxu1 %vm3393_vm2, %v3389_v51 }
 0x4d4   : > { %1573 = vadd.xlane.f32.xlu1 %v1572_v36  ;;  %v1569_v38 = vsel %vm1439_vm4, %v3206_v35, 0.0  ;;  %v1605_v39 = vpack.c.bf16 %v3206_v35, %v3200_v14 }
 0x4d5   : > { %1570 = vadd.xlane.f32.xlu0 %v1569_v38 }
 0x4d6   : > { %v3208_v18 = vpop.eup %3207  ;;  %3007 = vmatmul.mubr.msk.bf16.vlgmr.msra.gmra.mrb[28].mxu0 %vm1439_vm4, %v1605_v39 }
 0x4d7   : > { %v3210_v41 = vpop.eup %3209  ;;  %v1578_v43 = vsel %vm1439_vm4, %v3208_v18, 0.0  ;;  %3017 = vmatpush3.bf16.msra.mxu0 %v1938_v42  ;;  %3018 = vmatprep.mubr.msk.bf16.mxu0 %vm3393_vm2, %v3389_v51  ;;  %v1563_v51 = vsel %vm1439_vm4, %v3202_v17, 0.0  ;;  %v3174_v42 = vld [vmem:[%s3618_s21 + $0x8] sm:$0xff]  }
 0x4d8   : > { %1579 = vadd.xlane.f32.xlu1 %v1578_v43  ;;  %v1575_v44 = vsel %vm1439_vm4, %v3210_v41, 0.0  ;;  %v1606_v46 = vpack.c.bf16 %v3210_v41, %v3204_v56  ;;  %v3173_v56 = vld [vmem:[%s3618_s21] sm:$0xff]  }
 0x4d9   : > { %1576 = vadd.xlane.f32.xlu0 %v1575_v44  ;;  %3022 = vmatprep.subr.bf16.mxu1 %v3173_v56 }
 0x4da   : > { %3013 = vmatmul.mubr.msk.bf16.vlgmr.msra.gmra.mrb[28].mxu1 %vm1439_vm4, %v1606_v46 }
 0x4db   : > { %v3212_v47 = vpop.eup %3211  ;;  %3023 = vmatpush3.bf16.msra.mxu1 %v3173_v56 }
 0x4dc   : > { %v1581_v49 = vsel %vm1439_vm4, %v3212_v47, 0.0  ;;  %v1607_v50 = vpack.c.bf16 %v3212_v47, %v3208_v18  ;;  %1537 = vadd.xlane.f32.xlu1 %v1536_v22  ;;  %3024 = vmatprep.subr.bf16.mxu1 %v3174_v42 }
 0x4dd   : > { %1582 = vadd.xlane.f32.xlu0 %v1581_v49 }
 0x4de   : > { %3019 = vmatmul.mubr.msk.bf16.vlgmr.msra.gmra.mrb[32].mxu0 %vm1439_vm4, %v1607_v50 }
 0x4df   : > { %3025 = vmatpush3.bf16.msra.mxu1 %v3174_v42 }
 0x4e0   : > { %1561 = vadd.xlane.f32.xlu1 %v1560_v52 }
 0x4e1   : > { %1540 = vadd.xlane.f32.xlu0 %v1539_v29 }
 0x4e5   : > { %1564 = vadd.xlane.f32.xlu0 %v1563_v51 }
 0x530   : > { %v3893_v25 = vpop.f32.mrb[16].mxu1 }
 0x531   : > { %v2978_v31 = vpop.f32.mrb[17].mxu1 }
 0x532   : > { %v3895_v53 = vpop.f32.mrb[18].mxu1 }
 0x533   : > { %v2979_v55 = vpop.f32.mrb[19].mxu1 }
 0x54d   : > { %v1544_v58 = vpop.xlane.xlu0 %1543 }
 0x54e   : > { %3213 = vrcp.f32 %v1544_v58 }
 0x551   : > { %v1550_v60 = vpop.xlane.xlu0 %1549 }
 0x552   : > { %v1547_v37 = vpop.xlane.xlu1 %1546 }
 0x553   : > { %3215 = vrcp.f32 %v1547_v37 }
 0x554   : > { %3217 = vrcp.f32 %v1550_v60 }
 0x556   : > { %v1553_v32 = vpop.xlane.xlu0 %1552  ;;  %v1556_v61 = vpop.xlane.xlu1 %1555 }
 0x557   : > { %3219 = vrcp.f32 %v1553_v32 }
 0x558   : > { %3221 = vrcp.f32 %v1556_v61  ;;  %v3214_v1 = vpop.eup %3213 }
 0x55a   : > { %v1559_v33 = vpop.xlane.xlu0 %1558 }
 0x55b   : > { %3223 = vrcp.f32 %v1559_v33 }
 0x55d   : > { %v1568_v62 = vpop.xlane.xlu1 %1567  ;;  %v3216_v2 = vpop.eup %3215 }
 0x55e   : > { %v3218_v7 = vpop.eup %3217  ;;  %3225 = vrcp.f32 %v1568_v62 }
 0x561   : > { %v3220_v13 = vpop.eup %3219  ;;  %v1574_v15 = vpop.xlane.xlu1 %1573 }
 0x562   : > { %v1571_v45 = vpop.xlane.xlu0 %1570  ;;  %v3222_v24 = vpop.eup %3221 }
 0x563   : > { %3227 = vrcp.f32 %v1571_v45 }
 0x564   : > { %3229 = vrcp.f32 %v1574_v15 }
 0x565   : > { %v3224_v21 = vpop.eup %3223  ;;  %v1580_v14 = vpop.xlane.xlu1 %1579 }
 0x566   : > { %v1577_v19 = vpop.xlane.xlu0 %1576 }
 0x567   : > { %3231 = vrcp.f32 %v1577_v19 }
 0x568   : > { %3233 = vrcp.f32 %v1580_v14  ;;  %v3226_v38 = vpop.eup %3225 }
 0x56a   : > { %v1583_v17 = vpop.xlane.xlu0 %1582 }
 0x56b   : > { %3235 = vrcp.f32 %v1583_v17 }
 0x56d   : > { %v3228_v18 = vpop.eup %3227 }
 0x56e   : > { %v3230_v22 = vpop.eup %3229 }
 0x571   : > { %v3232_v52 = vpop.eup %3231 }
 0x572   : > { %v3234_v60 = vpop.eup %3233 }
 0x575   : > { %v3236_v61 = vpop.eup %3235 }
 0x599   : > { %v1695_v63 = vpop.f32.mrb[20].mxu0 }
 0x59a   : > { %v2984_v40 = vpop.f32.mrb[21].mxu0  ;;  %v1986_v5 = vmul.f32 %v3214_v1, %v1695_v63 }
 0x59b   : > { %v1698_v4 = vpop.f32.mrb[22].mxu0  ;;  %v1538_v40 = vpop.xlane.xlu1 %1537 }
 0x59c   : > { %v1987_v6 = vmul.f32 %v3216_v2, %v1698_v4  ;;  %v2985_v54 = vpop.f32.mrb[23].mxu0  ;;  %v1541_v2 = vpop.xlane.xlu0 %1540  ;;  %3237 = vrcp.f32 %v1538_v40 }
 0x59d   : > { %v1742_v48 = vpop.f32.mrb[20].mxu1  ;;  %3239 = vrcp.f32 %v1541_v2 }
 0x59e   : > { %v3141_v9 = vpack.i.bf16 %v1987_v6, %v1986_v5  ;;  %v2990_v11 = vpop.f32.mrb[21].mxu1  ;;  %v1988_v59 = vmul.f32 %v3218_v7, %v1742_v48 }
 0x59f   : > { %v1745_v16 = vpop.f32.mrb[22].mxu1  ;;  %v1562_v4 = vpop.xlane.xlu1 %1561 }
 0x5a0   : > { %v1989_v0 = vmul.f32 %v3220_v13, %v1745_v16  ;;  %v2991_v20 = vpop.f32.mrb[23].mxu1  ;;  %3142 = vrot.lane.b32.xlu1 %v3141_v9, %s3396_s20  ;;  %v1565_v5 = vpop.xlane.xlu0 %1564  ;;  %3241 = vrcp.f32 %v1562_v4 }
 0x5a1   : > { %v1789_v23 = vpop.f32.mrb[24].mxu0  ;;  %3243 = vrcp.f32 %v1565_v5 }
 0x5a2   : > { %v3146_v26 = vpack.i.bf16 %v1989_v0, %v1988_v59  ;;  %v2996_v27 = vpop.f32.mrb[25].mxu0  ;;  %v1990_v8 = vmul.f32 %v3222_v24, %v1789_v23 }
 0x5a3   : > { %v1792_v3 = vpop.f32.mrb[26].mxu0 }
 0x5a4   : > { %v1991_v28 = vmul.f32 %v3224_v21, %v1792_v3  ;;  %v2997_v30 = vpop.f32.mrb[27].mxu0  ;;  %3147 = vrot.lane.b32.xlu0 %v3146_v26, %s3397_s16 }
 0x5a5   : > { %v3899_v57 = vpop.f32.mrb[24].mxu1 }
 0x5a6   : > { %v3151_v10 = vpack.i.bf16 %v1991_v28, %v1990_v8  ;;  %v3002_v12 = vpop.f32.mrb[25].mxu1  ;;  %v3238_v54 = vpop.eup %3237 }
 0x5a7   : > { %v3901_v34 = vpop.f32.mrb[26].mxu1  ;;  %v3240_v48 = vpop.eup %3239  ;;  %v1984_v16 = vmul.f32 %v3238_v54, %v3893_v25 }
 0x5a8   : > { %v3003_v35 = vpop.f32.mrb[27].mxu1  ;;  %3152 = vrot.lane.b32.xlu1 %v3151_v10, %s3398_s0  ;;  %v1985_v19 = vmul.f32 %v3240_v48, %v3895_v53 }
 0x5a9   : > { %v1883_v36 = vpop.f32.mrb[28].mxu0 }
 0x5aa   : > { %v3008_v39 = vpop.f32.mrb[29].mxu0  ;;  %v1994_v43 = vmul.f32 %v3226_v38, %v1883_v36  ;;  %v3242_v28 = vpop.eup %3241 }
 0x5ab   : > { %v1886_v41 = vpop.f32.mrb[30].mxu0  ;;  %v3244_v17 = vpop.eup %3243  ;;  %v1992_v56 = vmul.f32 %v3242_v28, %v3899_v57  ;;  %v2828_v57 = vld [vmem:[%s4086_s1] ss:$0 sm:$0xff] }
 0x5ac   : > { %v1995_v44 = vmul.f32 %v3228_v18, %v1886_v41  ;;  %v3009_v46 = vpop.f32.mrb[31].mxu0  ;;  %v1993_v35 = vmul.f32 %v3244_v17, %v3901_v34 }
 0x5ad   : > { %v1930_v47 = vpop.f32.mrb[28].mxu1 }
 0x5ae   : > { %v3156_v49 = vpack.i.bf16 %v1995_v44, %v1994_v43  ;;  %v3014_v50 = vpop.f32.mrb[29].mxu1  ;;  %v1996_v51 = vmul.f32 %v3230_v22, %v1930_v47 }
 0x5af   : > { %v1933_v29 = vpop.f32.mrb[30].mxu1 }
 0x5b0   : > { %v1997_v31 = vmul.f32 %v3232_v52, %v1933_v29  ;;  %v3015_v55 = vpop.f32.mrb[31].mxu1  ;;  %3157 = vrot.lane.b32.xlu1 %v3156_v49, %s3396_s20 }
 0x5b1   : > { %v1977_v58 = vpop.f32.mrb[32].mxu0 }
 0x5b2   : > { %v3161_v37 = vpack.i.bf16 %v1997_v31, %v1996_v51  ;;  %v3020_v32 = vpop.f32.mrb[33].mxu0  ;;  %v1998_v62 = vmul.f32 %v3234_v60, %v1977_v58  ;;  %v3261_v31 = vld [vmem:[#allocation2] sm:$0xff] }
 0x5b3   : > { %v1980_v33 = vpop.f32.mrb[34].mxu0 }
 0x5b4   : > { %v1999_v63 = vmul.f32 %v3236_v61, %v1980_v33  ;;  %v3021_v1 = vpop.f32.mrb[35].mxu0  ;;  %3162 = vrot.lane.b32.xlu0 %v3161_v37, %s3397_s16  ;;  %v3262_v37 = vld [vmem:[#allocation2 + $0x8] sm:$0xff]  ;;  %v3263_v61 = vld [vmem:[#allocation2 + $0x10] sm:$0xff] }
 0x5b5   : > { %v3264_v1 = vld [vmem:[#allocation2 + $0x18] sm:$0xff] }
 0x5b6   : > { %v3166_v45 = vpack.i.bf16 %v1999_v63, %v1998_v62 }
 0x5b8   : > { %3167 = vrot.lane.b32.xlu1 %v3166_v45, %s3398_s0 }
 0x612   : > { %v3143_v6 = vpop.permute.xlu1 %3142 }
 0x613   : > { %v3145_v9 = vunpack.i.h.bf16 %v3143_v6  ;;  %v3144_v11 = vunpack.i.l.bf16 %v3143_v6 }
 0x615   : > { %v2024_v0 = vsel %vm1032_vm3, %v1984_v16, %v3144_v11  ;;  %v2025_v20 = vsel %vm1032_vm3, %v1985_v19, %v3145_v9 }
 0x616   : > { %v3148_v7 = vpop.permute.xlu0 %3147 }
 0x617   : > { %v3150_v13 = vunpack.i.h.bf16 %v3148_v7  ;;  %v3149_v15 = vunpack.i.l.bf16 %v3148_v7 }
 0x619   : > { %v2027_v26 = vsel %vm1439_vm4, %v2025_v20, %v3150_v13  ;;  %v2026_v27 = vsel %vm1439_vm4, %v2024_v0, %v3149_v15 }
 0x61a   : > { %v3153_v59 = vpop.permute.xlu1 %3152 }
 0x61b   : > { %v3155_v23 = vunpack.i.h.bf16 %v3153_v59  ;;  %v3154_v24 = vunpack.i.l.bf16 %v3153_v59 }
 0x61d   : > { %v2029_v21 = vsel %vm2028_vm5, %v2026_v27, %v3154_v24  ;;  %v2030_v3 = vsel %vm2028_vm5, %v2027_v26, %v3155_v23 }
 0x61e   : > { %v2061_v25 = vpack.c.bf16 %v2030_v3, %v2029_v21  ;;  %v3175_v21 = vld [vmem:[%s3635_s4] sm:$0xff]   ;;  %v3176_v3 = vld [vmem:[%s3635_s4 + $0x8] sm:$0xff]  }
 0x61f   : > { %3030 = vmatprep.subr.bf16.mxu0 %v3175_v21 }
 0x620   : > { %3026 = vmatprep.mubr.msk.bf16.mxu1 %vm958_vm1, %v2061_v25  ;;  %3031 = vmatpush3.bf16.msra.mxu0 %v3175_v21  ;;  %v3177_v25 = vld [vmem:[%s3645_s18] sm:$0xff]  }
 0x621   : > { %3032 = vmatprep.subr.bf16.mxu0 %v3176_v3  ;;  %3038 = vmatprep.subr.bf16.mxu1 %v3177_v25 }
 0x622   : > { %v3158_v53 = vpop.permute.xlu1 %3157 }
 0x623   : > { %v3160_v30 = vunpack.i.h.bf16 %v3158_v53  ;;  %v3159_v14 = vunpack.i.l.bf16 %v3158_v53  ;;  %v3178_v53 = vld [vmem:[%s3645_s18 + $0x8] sm:$0xff]  }
 0x624   : > { %3033 = vmatpush3.bf16.msra.mxu0 %v3176_v3 }
 0x625   : > { %v2055_v38 = vsel %vm1032_vm3, %v1992_v56, %v3159_v14  ;;  %v2056_v39 = vsel %vm1032_vm3, %v1993_v35, %v3160_v30 }
 0x626   : > { %v3163_v8 = vpop.permute.xlu0 %3162 }
 0x627   : > { %v3165_v10 = vunpack.i.h.bf16 %v3163_v8  ;;  %v3164_v12 = vunpack.i.l.bf16 %v3163_v8 }
 0x629   : > { %v2058_v42 = vsel %vm1439_vm4, %v2056_v39, %v3165_v10  ;;  %v2057_v43 = vsel %vm1439_vm4, %v2055_v38, %v3164_v12 }
 0x62a   : > { %v3168_v36 = vpop.permute.xlu1 %3167 }
 0x62b   : > { %v3170_v18 = vunpack.i.h.bf16 %v3168_v36  ;;  %v3169_v41 = vunpack.i.l.bf16 %v3168_v36 }
 0x62d   : > { %v2059_v44 = vsel %vm2028_vm5, %v2057_v43, %v3169_v41  ;;  %v2060_v46 = vsel %vm2028_vm5, %v2058_v42, %v3170_v18  ;;  %v2833_v41 = vld [vmem:[%s4087_s30] ss:$0 sm:$0xff] }
 0x62e   : > { %v2062_v47 = vpack.c.bf16 %v2060_v46, %v2059_v44 }
 0x630   : > { %3027 = vmatmul.mubr.msk.bf16.vlgmr.msra.gmra.mrb[32].mxu1 %vm958_vm1, %v2062_v47 }
 0x631   : > { %3039 = vmatpush3.bf16.msra.mxu1 %v3177_v25 }
 0x632   : > { %3040 = vmatprep.subr.bf16.mxu1 %v3178_v53 }
 0x635   : > { %3041 = vmatpush3.bf16.msra.mxu1 %v3178_v53 }
 0x703   : > { %v3028_v34 = vpop.f32.mrb[32].mxu1 }
 0x704   : > { %v2126_v22 = vpop.f32.mrb[33].mxu1  ;;  %v2135_v49 = vadd.f32 %v3028_v34, %v2828_v57 }
 0x705   : > { %v2127_v50 = vadd.f32 %v2828_v57, %v2126_v22  ;;  %v3029_v52 = vpop.f32.mrb[34].mxu1 }
 0x706   : > { %v2129_v29 = vpop.f32.mrb[35].mxu1  ;;  %v2138_v58 = vadd.f32 %v3029_v52, %v2828_v57  ;;  %v2143_v33 = vadd.f32 %v3263_v61, %v2135_v49  ;;  %v3180_v61 = vld [vmem:[%s3645_s18 + $0x18] sm:$0xff]  }
 0x707   : > { %v2130_v51 = vadd.f32 %v2828_v57, %v2129_v29  ;;  %v2141_v55 = vadd.f32 %v3261_v31, %v2127_v50  ;;  %v2834_v57 = vld [vmem:[%s4088_s27] ss:$0 sm:$0xff] }
 0x708   : > { %v2153_v63 = vsel %vm958_vm1, %v2143_v33, 0.0  ;;  %v2144_v45 = vadd.f32 %v3264_v1, %v2138_v58 }
 0x709   : > { %v2147_v60 = vsel %vm958_vm1, %v2141_v55, 0.0  ;;  %v2142_v32 = vadd.f32 %v3262_v37, %v2130_v51 }
 0x70a   : > { %2148 = vadd.xlane.f32.xlu0 %v2147_v60  ;;  %v2156_v40 = vsel %vm958_vm1, %v2144_v45, 0.0 }
 0x70b   : > { %v2150_v62 = vsel %vm958_vm1, %v2142_v32, 0.0 }
 0x70c   : > { %2151 = vadd.xlane.f32.xlu1 %v2150_v62 }
 0x70e   : > { %2154 = vadd.xlane.f32.xlu0 %v2153_v63 }
 0x712   : > { %2157 = vadd.xlane.f32.xlu0 %v2156_v40 }
 0x797   : > { %v2149_v2 = vpop.xlane.xlu0 %2148 }
 0x798   : > { %v2160_v4 = vmul.f32 0.03125, %v2149_v2 }
 0x799   : > { %v2152_v5 = vpop.xlane.xlu1 %2151 }
 0x79a   : > { %v2164_v6 = vsub.f32 %v2141_v55, %v2160_v4  ;;  %v2161_v54 = vmul.f32 0.03125, %v2152_v5 }
 0x79b   : > { %v2155_v48 = vpop.xlane.xlu0 %2154 }
 0x79c   : > { %v2165_v7 = vsub.f32 %v2142_v32, %v2161_v54  ;;  %v2162_v9 = vmul.f32 0.03125, %v2155_v48  ;;  %v2168_v11 = vmul.f32 %v2164_v6, %v2164_v6  ;;  %v3179_v32 = vld [vmem:[%s3645_s18 + $0x10] sm:$0xff]  }
 0x79d   : > { %3042 = vmatprep.subr.bf16.mxu1 %v3179_v32 }
 0x79e   : > { %v2166_v13 = vsub.f32 %v2143_v33, %v2162_v9  ;;  %v2172_v15 = vsel %vm958_vm1, %v2168_v11, 0.0  ;;  %v2169_v16 = vmul.f32 %v2165_v7, %v2165_v7  ;;  %3043 = vmatpush3.bf16.msra.mxu1 %v3179_v32  ;;  %v2835_v33 = vld [vmem:[%s785_s6] ss:$0 sm:$0xff] }
 0x79f   : > { %2173 = vadd.xlane.f32.xlu1 %v2172_v15  ;;  %v2158_v19 = vpop.xlane.xlu0 %2157  ;;  %3044 = vmatprep.subr.bf16.mxu1 %v3180_v61 }
 0x7a0   : > { %v2163_v59 = vmul.f32 0.03125, %v2158_v19  ;;  %v2175_v0 = vsel %vm958_vm1, %v2169_v16, 0.0  ;;  %v2170_v20 = vmul.f32 %v2166_v13, %v2166_v13 }
 0x7a1   : > { %2176 = vadd.xlane.f32.xlu0 %v2175_v0 }
 0x7a2   : > { %v2167_v23 = vsub.f32 %v2144_v45, %v2163_v59  ;;  %v2178_v24 = vsel %vm958_vm1, %v2170_v20, 0.0  ;;  %3045 = vmatpush3.bf16.msra.mxu1 %v3180_v61 }
 0x7a3   : > { %2179 = vadd.xlane.f32.xlu1 %v2178_v24 }
 0x7a4   : > { %v2171_v26 = vmul.f32 %v2167_v23, %v2167_v23 }
 0x7a6   : > { %v2181_v27 = vsel %vm958_vm1, %v2171_v26, 0.0 }
 0x7a7   : > { %2182 = vadd.xlane.f32.xlu0 %v2181_v27 }
 0x82c   : > { %v2174_v8 = vpop.xlane.xlu1 %2173 }
 0x82d   : > { %v2184_v28 = vmul.f32 0.03125, %v2174_v8 }
 0x82e   : > { %v2177_v30 = vpop.xlane.xlu0 %2176 }
 0x82f   : > { %v2188_v14 = vadd.f32 1e-05, %v2184_v28  ;;  %v2185_v17 = vmul.f32 0.03125, %v2177_v30 }
 0x830   : > { %v2180_v10 = vpop.xlane.xlu1 %2179 }
 0x831   : > { %3245 = vrsqrt.f32 %v2188_v14  ;;  %v2189_v12 = vadd.f32 1e-05, %v2185_v17  ;;  %v2186_v56 = vmul.f32 0.03125, %v2180_v10 }
 0x833   : > { %3247 = vrsqrt.f32 %v2189_v12  ;;  %v2190_v35 = vadd.f32 1e-05, %v2186_v56 }
 0x834   : > { %v2183_v36 = vpop.xlane.xlu0 %2182 }
 0x835   : > { %3249 = vrsqrt.f32 %v2190_v35  ;;  %v2187_v38 = vmul.f32 0.03125, %v2183_v36 }
 0x837   : > { %v2191_v39 = vadd.f32 1e-05, %v2187_v38 }
 0x839   : > { %3251 = vrsqrt.f32 %v2191_v39 }
 0x83b   : > { %v3246_v18 = vpop.eup %3245 }
 0x83c   : > { %v2196_v42 = vmul.f32 %v3246_v18, %v2164_v6 }
 0x83d   : > { %v3248_v43 = vpop.eup %3247 }
 0x83e   : > { %v2197_v44 = vmul.f32 %v3248_v43, %v2165_v7  ;;  %v2206_v46 = vmul.f32 %v2833_v41, %v2196_v42 }
 0x83f   : > { %v3250_v47 = vpop.eup %3249 }
 0x840   : > { %v2198_v34 = vmul.f32 %v3250_v47, %v2166_v13  ;;  %v2207_v22 = vmul.f32 %v2833_v41, %v2197_v44  ;;  %v2216_v49 = vadd.f32 %v2834_v57, %v2206_v46  ;;  %v2840_v13 = vld [vmem:[%s793_s24] ss:$0 sm:$0xff] }
 0x842   : > { %v2217_v50 = vadd.f32 %v2834_v57, %v2207_v22  ;;  %v2208_v29 = vmul.f32 %v2833_v41, %v2198_v34 }
 0x843   : > { %v3252_v52 = vpop.eup %3251 }
 0x844   : > { %v2199_v51 = vmul.f32 %v3252_v52, %v2167_v23  ;;  %v2220_v31 = vpack.c.bf16 %v2217_v50, %v2216_v49  ;;  %v2218_v58 = vadd.f32 %v2834_v57, %v2208_v29 }
 0x846   : > { %v2209_v55 = vmul.f32 %v2833_v41, %v2199_v51  ;;  %3034 = vmatprep.mubr.msk.bf16.mxu0 %vm958_vm1, %v2220_v31 }
 0x848   : > { %v2219_v60 = vadd.f32 %v2834_v57, %v2209_v55 }
 0x84a   : > { %v2221_v37 = vpack.c.bf16 %v2219_v60, %v2218_v58 }
 0x84c   : > { %3035 = vmatmul.mubr.msk.bf16.vlgmr.msra.gmra.mrb[36].mxu0 %vm958_vm1, %v2221_v37 }
 0x91f   : > { %v3036_v62 = vpop.f32.mrb[36].mxu0 }
 0x920   : > { %v2294_v63 = vadd.f32 %v3036_v62, %v2835_v33  ;;  %v2285_v1 = vpop.f32.mrb[37].mxu0  ;;  %v2847_v62 = vld [vmem:[%s796_s19] ss:$0 sm:$0xff] }
 0x921   : > { %v2286_v45 = vadd.f32 %v2835_v33, %v2285_v1  ;;  %v3037_v40 = vpop.f32.mrb[38].mxu0 }
 0x922   : > { %v2297_v2 = vadd.f32 %v3037_v40, %v2835_v33  ;;  %v2288_v4 = vpop.f32.mrb[39].mxu0  ;;  %v2302_v6 = vmax.f32 %v2294_v63, 0.0 }
 0x923   : > { %v2289_v5 = vadd.f32 %v2835_v33, %v2288_v4  ;;  %v2300_v48 = vmax.f32 %v2286_v45, 0.0  ;;  %v2848_v45 = vld [vmem:[%s799_s3] ss:$0 sm:$0xff] }
 0x924   : > { %v2303_v54 = vmax.f32 %v2297_v2, 0.0 }
 0x925   : > { %v2301_v7 = vmax.f32 %v2289_v5, 0.0 }
 0x926   : > { %v2305_v9 = vpack.c.bf16 %v2303_v54, %v2302_v6 }
 0x927   : > { %v2304_v11 = vpack.c.bf16 %v2301_v7, %v2300_v48 }
 0x929   : > { %3046 = vmatprep.mubr.msk.bf16.mxu1 %vm2345_vm6, %v2304_v11 }
 0x92a   : > { %3047 = vmatmul.mubr.msk.bf16.vlgmr.msra.gmra.mrb[36].mxu1 %vm2345_vm6, %v2305_v9 }
 0x9fd   : > { %v3048_v15 = vpop.f32.mrb[36].mxu1 }
 0x9fe   : > { %v2386_v16 = vpop.f32.mrb[37].mxu1  ;;  %v2395_v19 = vadd.f32 %v3048_v15, %v2840_v13 }
 0x9ff   : > { %v2387_v59 = vadd.f32 %v2840_v13, %v2386_v16  ;;  %v3049_v0 = vpop.f32.mrb[38].mxu1 }
 0xa00   : > { %v2389_v20 = vpop.f32.mrb[39].mxu1  ;;  %v2398_v23 = vadd.f32 %v3049_v0, %v2840_v13  ;;  %v2403_v3 = vadd.f32 %v2395_v19, %v2218_v58  ;;  %v2488_v0 = vld [vmem:[#allocation3] sm:$0x1] (!%p2849_p4) }
 0xa01   : > { %v2390_v24 = vadd.f32 %v2840_v13, %v2389_v20  ;;  %v2401_v26 = vadd.f32 %v2387_v59, %v2216_v49  ;;  %v3399_v59 = vmov (!%p2849_p4), 0.0|0.0   ;;  %v3401_v20 = vmov (!%p2849_p4), 0.0  }
 0xa02   : > { %v2404_v53 = vadd.f32 %v2398_v23, %v2219_v60  ;;  %v2413_v8 = vsel %vm958_vm1, %v2403_v3, 0.0  ;;  %3061 = vmatprep.subr.bf16.mxu0 (!%p2849_p4), %v3399_v59  ;;  %3058 = vmatprep.mubr.msk.f32.mxu0 (!%p2849_p4), %vm3400_vm8, %v3401_v20  ;;  %v3402_v23 = vmov (!%p2849_p4), 0  }
 0xa03   : > { %v2407_v27 = vsel %vm958_vm1, %v2401_v26, 0.0  ;;  %v2402_v21 = vadd.f32 %v2390_v24, %v2217_v50  ;;  %3265 = vset.pattern.permute.xlu0 (!%p2849_p4), %v3402_v23 }
 0xa04   : > { %2408 = vadd.xlane.f32.xlu1 %v2407_v27  ;;  %v2416_v28 = vsel %vm958_vm1, %v2404_v53, 0.0  ;;  %v2494_v27 = vlaneseq (!%p2849_p4) }
 0xa05   : > { %v2410_v25 = vsel %vm958_vm1, %v2402_v21, 0.0 }
 0xa06   : > { %2411 = vadd.xlane.f32.xlu0 %v2410_v25 }
 0xa08   : > { %2414 = vadd.xlane.f32.xlu1 %v2413_v8 }
 0xa0a   : > { %2417 = vadd.xlane.f32.xlu0 %v2416_v28 }
 0xa91   : > { %v2409_v30 = vpop.xlane.xlu1 %2408 }
 0xa92   : > { %v2419_v14 = vmul.f32 0.03125, %v2409_v30 }
 0xa93   : > { %v2412_v17 = vpop.xlane.xlu0 %2411 }
 0xa94   : > { %v2423_v10 = vsub.f32 %v2401_v26, %v2419_v14  ;;  %v2420_v12 = vmul.f32 0.03125, %v2412_v17  ;;  %v2487_v26 = vld [vmem:[%s4089_s2] sm:$0x1] (!%p2849_p4) }
 0xa95   : > { %v2415_v56 = vpop.xlane.xlu1 %2414 }
 0xa96   : > { %v2424_v35 = vsub.f32 %v2402_v21, %v2420_v12  ;;  %v2421_v36 = vmul.f32 0.03125, %v2415_v56  ;;  %v2427_v38 = vmul.f32 %v2423_v10, %v2423_v10  ;;  %v2495_v21 = vshrl.u32 (!%p2849_p4), %v2494_v27, 7 }
 0xa97   : > { %v2418_v39 = vpop.xlane.xlu0 %2417 }
 0xa98   : > { %v2425_v18 = vsub.f32 %v2403_v3, %v2421_v36  ;;  %v2422_v41 = vmul.f32 0.03125, %v2418_v39  ;;  %v2431_v42 = vsel %vm958_vm1, %v2427_v38, 0.0  ;;  %v2428_v43 = vmul.f32 %v2424_v35, %v2424_v35 }
 0xa99   : > { %2432 = vadd.xlane.f32.xlu1 %v2431_v42  ;;  %v2496_v3 = vsub.s32 (!%p2849_p4), 0, %v2495_v21 }
 0xa9a   : > { %v2426_v44 = vsub.f32 %v2404_v53, %v2422_v41  ;;  %v2434_v46 = vsel %vm958_vm1, %v2428_v43, 0.0  ;;  %v2429_v47 = vmul.f32 %v2425_v18, %v2425_v18 }
 0xa9b   : > { %2435 = vadd.xlane.f32.xlu0 %v2434_v46 }
 0xa9c   : > { %v2437_v57 = vsel %vm958_vm1, %v2429_v47, 0.0  ;;  %v2430_v34 = vmul.f32 %v2426_v44, %v2426_v44 }
 0xa9d   : > { %2438 = vadd.xlane.f32.xlu1 %v2437_v57 }
 0xa9e   : > { %v2440_v22 = vsel %vm958_vm1, %v2430_v34, 0.0 }
 0xa9f   : > { %2441 = vadd.xlane.f32.xlu0 %v2440_v22 }
 0xab5   : > { %2491 = vperm.xlu0 (!%p2849_p4), %3265, %v2488_v0  }
 0xb26   : > { %v2433_v49 = vpop.xlane.xlu1 %2432 }
 0xb27   : > { %v2443_v50 = vmul.f32 0.03125, %v2433_v49 }
 0xb28   : > { %v2436_v52 = vpop.xlane.xlu0 %2435 }
 0xb29   : > { %v2447_v29 = vadd.f32 1e-05, %v2443_v50  ;;  %v2444_v51 = vmul.f32 0.03125, %v2436_v52 }
 0xb2a   : > { %v2439_v31 = vpop.xlane.xlu1 %2438 }
 0xb2b   : > { %3253 = vrsqrt.f32 %v2447_v29  ;;  %v2448_v55 = vadd.f32 1e-05, %v2444_v51  ;;  %v2445_v58 = vmul.f32 0.03125, %v2439_v31 }
 0xb2c   : > { %v2442_v60 = vpop.xlane.xlu0 %2441 }
 0xb2d   : > { %3255 = vrsqrt.f32 %v2448_v55  ;;  %v2449_v37 = vadd.f32 1e-05, %v2445_v58  ;;  %v2446_v32 = vmul.f32 0.03125, %v2442_v60 }
 0xb2f   : > { %3257 = vrsqrt.f32 %v2449_v37  ;;  %v2450_v61 = vadd.f32 1e-05, %v2446_v32 }
 0xb31   : > { %3259 = vrsqrt.f32 %v2450_v61 }
 0xb34   : > { %v2492_v25 = vpop.permute.xlu0 (!%p2849_p4), %2491 }
 0xb35   : > { %v3254_v33 = vpop.eup %3253  ;;  %v2497_v53 = vrot.slane (!%p2849_p4), %v2492_v25, %v2496_v3 }
 0xb36   : > { %v2455_v63 = vmul.f32 %v3254_v33, %v2423_v10 }
 0xb37   : > { %v3256_v1 = vpop.eup %3255 }
 0xb38   : > { %v2465_v40 = vmul.f32 %v2847_v62, %v2455_v63  ;;  %v2456_v2 = vmul.f32 %v3256_v1, %v2424_v35 }
 0xb39   : > { %v3258_v4 = vpop.eup %3257 }
 0xb3a   : > { %v2475_v5 = vadd.f32 %v2848_v45, %v2465_v40  ;;  %v2466_v6 = vmul.f32 %v2847_v62, %v2456_v2  ;;  %v2457_v54 = vmul.f32 %v3258_v4, %v2425_v18 }
 0xb3b   : > { %v3260_v48 = vpop.eup %3259 }
 0xb3c   : > { %2479 = vst.msk [vmem:[#allocation2] sm:$0xff] %vm958_vm1, %v2475_v5  ;;  %v2476_v7 = vadd.f32 %v2848_v45, %v2466_v6  ;;  %v2467_v9 = vmul.f32 %v2847_v62, %v2457_v54  ;;  %v2458_v11 = vmul.f32 %v3260_v48, %v2426_v44  ;;  %2486 = sbr.rel (%p2849_p4) target bundleno = 3110 (0xc26), region = 108 }
 0xb3e   : > { %2480 = vst.msk [vmem:[#allocation2 + $0x8] sm:$0xff] %vm958_vm1, %v2476_v7  ;;  %v2477_v13 = vadd.f32 %v2848_v45, %v2467_v9  ;;  %v2468_v15 = vmul.f32 %v2847_v62, %v2458_v11  ;;  %v3062_v19 = vpack.c.bf16 (!%p2849_p4), %v2476_v7, %v2475_v5 }
 0xb40   : > { %2481 = vst.msk [vmem:[#allocation2 + $0x10] sm:$0xff] %vm958_vm1, %v2477_v13  ;;  %v2478_v16 = vadd.f32 %v2848_v45, %v2468_v15  ;;  %3064 = vmatpush3.bf16.xpose.msk.msra.mxu0 (!%p2849_p4), %vm3063_vm7, %v3062_v19 }
 0xb41   : > { %3065 = vmatprep.subr.bf16.mxu0 (!%p2849_p4), %v3399_v59 }
 0xb42   : > { %2482 = vst.msk [vmem:[#allocation2 + $0x18] sm:$0xff] %vm958_vm1, %v2478_v16  ;;  %v3066_v24 = vpack.c.bf16 (!%p2849_p4), %v2478_v16, %v2477_v13 }
 0xb48   : > { %3068 = vmatpush3.bf16.xpose.msk.msra.mxu0 %vm3063_vm7, %v3066_v24 }
 0xb4f   : > { %3059 = vmatmul.mubr.msk.f32.vlgmr.msra.gmra.mrb[0].mxu0 %vm958_vm1, %v2487_v26 }
 0xc22   : > { %v2579_v8 = vpop.f32.mrb[0].mxu0 }
 0xc23   : > { %v2580_v28 = vadd.f32 %v2579_v8, %v2497_v53  ;;  %v3060_v30 = vpop.f32.mrb[1].mxu0 }
 0xc25   : > { %2584 = vst.msk [vmem:[#allocation9] sm:$0x1] %vm2583_vm9, %v2580_v28 }
 0xc26 PF: > { %s4090_s19 = sld [smem:[#allocation14_spill]]  ;;  %s3403_s4 = smov [#allocation9]  }
 0xc27   : > { %s2594_s25 = sshll.u32 %s3403_s4, 4  ;;  %s2595_s25 = int_to_ptr.vmem [resolvable:$true] %s2594_s25 }
 0xc28   : > { %s3322_s30 = scalar_lea.vmem %s2595_s25, 16  ;;  %s3328_s26 = scalar_lea.vmem %s2595_s25, 32 }
 0xc29   : > { %p3323_p10 = scmp.ne.s32.totalorder %s2595_s25, %s3322_s30  ;;  %p3329_p13 = scmp.lt.s32.totalorder %s2595_s25, %s2595_s25 }
 0xc2a   : > { %p3330_p0 = scmp.lt.s32.totalorder %s3328_s26, %s3322_s30 }
 0xc2c   : > { %s4091_s17 = sadd.s32 4294967295, %s4090_s19   ;;  %p3331_p1 = por %p3330_p0, %p3329_p13 }
 0xc2d   : > { %p3999_p9 = scmp.eq.s32.totalorder %s4091_s17, 1 }
 0xc2f   : > { %p3324_p11 = pnand %p3323_p10, %p3999_p9 }
 0xc31   : > { %p3325_p12 = pneg %p3324_p11 }
 0xc33   : > { %p3332_p2 = pnand %p3331_p1, %p3325_p12 }
 0xc35   : > { %3335 = shalt.err (!%p3332_p2)
}
 0xc36   : > { %s4093_s22 = sld [smem:[#allocation23_spill]] }
 0xc3c   : > { %s3336_s20 = scalar_lea.hbm %s4093_s22, 16 }
 0xc3d   : > { %p3337_p5 = scmp.ne.s32.totalorder %s4093_s22, %s3336_s20  ;;  %p3342_p3 = scmp.lt.u32.totalorder %s3336_s20, %s4093_s22 }
 0xc3f   : > { %p3338_p7 = pnand %p3337_p5, %p3999_p9 }
 0xc41   : > { %p3339_p8 = pneg %p3338_p7 }
 0xc43   : > { %p3344_p6 = pnand %p3342_p3, %p3339_p8 }
 0xc45   : > { %3347 = shalt.err (!%p3344_p6)
}
 0xc46   : > { %3078 = dma.vmem_to_hbm [thread:$0]  (%p3999_p9), %s2595_s25, 16, %s4093_s22, [#allocation6]  }
 0xc47   : > { %3369 = dma.done.wait (%p3999_p9), [#allocation6], 16  }
 0xc48   : > { %3371 = vsyncadd (%p3999_p9), [#allocation6], 4294967280 }
 0xc49 PF: > { %s4094_s3 = sld [smem:[#allocation14_spill]]  ;;  %s4095_s29 = sld [smem:[#allocation13_spill]] }
 0xc4a   : > { %s4096_s30 = sld [smem:[#allocation15_spill]] }
 0xc4f   : > { %s33_s0 = sadd.s32 1, %s4094_s3  }
 0xc50   : > { %p30_p4 = scmp.ge.s32.totalorder %s33_s0, 4  }
 0xc52   :  { %32 = sbr.rel (!%p30_p4) target bundleno = 13 (0xd), region = 174 }
 0xc59   :  { %2607 = vsyncpa [#allocation5], 1 }
 0xc5a   :  { %2609 = vsyncpa [#allocation5 + $0x1], 1 }
 0xc5b   :  { %2610 = vsyncpa [#allocation8], 1 }
 0xc5c   :  { %2611 = vsyncpa [#allocation6], 1 }
 0xc5d   :  { %2613 = vsyncpa [#allocation6 + $0x1], 1 }

</bundles_post_ra>
